<compile_context>
chip_gen: v7x
topology: tpu7x:2x2x1
jax: 0.10.0
libtpu: 0.0.40
codegen_flags: <defaults>
</compile_context>

<pallas_src>
import functools

import numpy as np
import jax
import jax.numpy as jnp
from jax import lax
from jax.experimental import pallas as pl
from jax.experimental.pallas import tpu as pltpu

EULER_GAMMA = 0.5772156649015329


def average_path_length(n):
    """sklearn's _average_path_length (c(n))."""
    n = np.asarray(n, dtype=np.float64)
    out = np.zeros_like(n)
    out = np.where(n == 2, 1.0, out)
    big = 2.0 * (np.log(np.maximum(n - 1.0, 1.0)) + EULER_GAMMA) \
        - 2.0 * (n - 1.0) / np.maximum(n, 1.0)
    out = np.where(n > 2, big, out)
    return out


def _default_tree_block():
    """Pick trees-per-block so the block-diagonal route is one MXU tile."""
    try:
        kind = jax.devices()[0].device_kind.lower()
    except Exception:
        return 4
    if "v5 lite" in kind or "v5e" in kind or "v5lite" in kind:
        return 2   # 128-wide MXU: route = one 128x128 tile
    return 4       # 256-wide MXU (v6e / v7x): route = one 256x256 tile


# ----------------------------------------------------------------------------
# Pallas kernel: one grid step == one block of samples; all trees processed
# inside via a partially-unrolled loop over tree blocks.
# ----------------------------------------------------------------------------
def iforest_kernel(x_ref, fs_ref, thr_ref, lv_ref, route_ref, tgt_hi_ref,
                   out_ref, acc_ref, *, n_blocks, unroll, neg_inv_denom,
                   offset):
    x = x_ref[...]                         # (Nb, D)          f32
    route = route_ref[...]                 # (Tb*Mp, Tb*L)    bf16, block-diag
    tgt_hi = tgt_hi_ref[...]               # (1, Tb*L)        f32 = popcount-0.5

    acc_ref[...] = jnp.zeros_like(acc_ref)

    def step(b):
        fs = fs_ref[b]                     # (D, Tb*Mp) f32 one-hot selectors
        thr = thr_ref[b]                   # (1, Tb*Mp) f32 thresholds
        lv = lv_ref[b]                     # (1, Tb*L)  f32 leaf path lengths
        # exact feature gather: feat[n, m] = x[n, feat_idx[m]] (exact f32)
        feat = jnp.dot(x, fs, preferred_element_type=jnp.float32,
                       precision=lax.Precision.HIGHEST)          # (Nb, Tb*Mp)
        go_right = (feat > thr).astype(jnp.bfloat16)              # exact 0/1
        # signed ancestor routing: score <= popcount, equality <=> leaf reached
        score = jnp.dot(go_right, route,
                        preferred_element_type=jnp.float32)       # (Nb, Tb*L)
        acc_ref[...] += jnp.where(score > tgt_hi, lv, 0.0)        # cmp+sel+add

    # Partial unroll: outer scf.for over trips, `unroll` copies of step inside.
    n_outer = n_blocks // unroll
    if n_outer > 0:
        @pl.loop(0, n_outer)
        def _(o):
            for u in range(unroll):
                step(o * unroll + u)
    for b in range(n_outer * unroll, n_blocks):   # static remainder (if any)
        step(b)

    depths = jnp.sum(acc_ref[...], axis=-1, keepdims=True)        # (Nb, 1)
    out_ref[...] = -jnp.exp2(depths * neg_inv_denom) - offset


def isolation_forest_decision_function(x, fs, thr, lv, route, tgt_hi, *,
                                       n_trees, c_psi, offset,
                                       sample_block=512, unroll=5):
    N, D = x.shape
    n_blocks = fs.shape[0]
    tbl = route.shape[1]

    if N <= sample_block:
        # Split into two half-blocks so the parallel grid axis has >=2 entries
        # (lets v7x shard sample blocks across both TensorCores).
        half = -(-N // 2)
        nb = max(8, ((half + 7) // 8) * 8)
        n_pad = 2 * nb
    else:
        n_pad = ((N + sample_block - 1) // sample_block) * sample_block
        nb = sample_block
    x_p = jnp.pad(x, ((0, n_pad - N), (0, 0)))

    unroll = max(1, min(unroll, n_blocks))
    neg_inv_denom = -1.0 / (float(n_trees) * float(c_psi))
    kernel = functools.partial(iforest_kernel, n_blocks=n_blocks,
                               unroll=unroll, neg_inv_denom=neg_inv_denom,
                               offset=float(offset))

    out = pl.pallas_call(
        kernel,
        out_shape=jax.ShapeDtypeStruct((n_pad, 1), jnp.float32),
        grid_spec=pltpu.PrefetchScalarGridSpec(
            num_scalar_prefetch=0,
            grid=(n_pad // nb,),
            in_specs=[
                pl.BlockSpec((nb, D), lambda i: (i, 0)),        # x, sample-tiled
                pl.BlockSpec(fs.shape, lambda i: (0, 0, 0)),    # one-hot selectors (resident)
                pl.BlockSpec(thr.shape, lambda i: (0, 0, 0)),   # thresholds (resident)
                pl.BlockSpec(lv.shape, lambda i: (0, 0, 0)),    # leaf path lengths (resident)
                pl.BlockSpec(route.shape, lambda i: (0, 0)),    # block-diag routing (resident)
                pl.BlockSpec(tgt_hi.shape, lambda i: (0, 0)),   # popcount-0.5 targets (resident)
            ],
            out_specs=pl.BlockSpec((nb, 1), lambda i: (i, 0)),
            scratch_shapes=[pltpu.VMEM((nb, tbl), jnp.float32)],
        ),
        compiler_params=pltpu.CompilerParams(
            dimension_semantics=("parallel",)),
    )(x_p, fs, thr, lv, route, tgt_hi)
    return out[:N, 0]


# ----------------------------------------------------------------------------
# Deterministic synthetic forest construction (replaces sklearn `fit`).
# ----------------------------------------------------------------------------
def build_forest(key, n_estimators, n_features, depth, tree_block):
    M = 2 ** depth - 1          # real internal nodes of a complete binary tree
    Mp = 2 ** depth             # padded node count (one dummy node per tree)
    L = 2 ** depth              # leaves
    T = n_estimators
    n_blocks = -(-T // tree_block)
    Tp = n_blocks * tree_block  # padded tree count (dummy trees contribute 0)

    k1, k2, k3 = jax.random.split(key, 3)
    feat_idx = np.asarray(jax.random.randint(k1, (T, M), 0, n_features))
    thr = np.asarray(jax.random.uniform(k2, (T, M), minval=-1.5, maxval=1.5,
                                        dtype=jnp.float32))
    leaf_n = np.asarray(jax.random.randint(k3, (T, L), 1, 64))
    leaf_path = depth + average_path_length(leaf_n)                    # (T, L)

    BIG = np.float32(np.finfo(np.float32).max)
    # per-tree padded arrays; dummy nodes/trees: zero selector, thr=+FLT_MAX,
    # leaf values 0 (so padding trees contribute nothing to the sum).
    fs_p = np.zeros((Tp, n_features, Mp), dtype=np.float32)
    thr_p = np.full((Tp, 1, Mp), BIG, dtype=np.float32)
    lv_p = np.zeros((Tp, 1, L), dtype=np.float32)
    for t in range(T):
        fs_p[t, feat_idx[t], np.arange(M)] = 1.0
        thr_p[t, 0, :M] = thr[t]
        lv_p[t, 0, :] = leaf_path[t]

    # pack tree_block trees per lane-group: (n_blocks, D, Tb*Mp) etc.
    fs_b = fs_p.reshape(n_blocks, tree_block, n_features, Mp)
    fs_b = fs_b.transpose(0, 2, 1, 3).reshape(n_blocks, n_features,
                                              tree_block * Mp)
    thr_b = thr_p.reshape(n_blocks, tree_block, 1, Mp)
    thr_b = thr_b.transpose(0, 2, 1, 3).reshape(n_blocks, 1, tree_block * Mp)
    lv_b = lv_p.reshape(n_blocks, tree_block, 1, L)
    lv_b = lv_b.transpose(0, 2, 1, 3).reshape(n_blocks, 1, tree_block * L)

    # Shared routing structure: for leaf j of a tree, route[m, j] = +1 if
    # ancestor node m lies on the path and the path goes right there, -1 if it
    # goes left, 0 otherwise (dummy node row stays 0). target[j] = popcount(j).
    route1 = np.zeros((Mp, L), dtype=np.float32)
    target1 = np.zeros((1, L), dtype=np.float32)
    for j in range(L):
        bits = [(j >> (depth - 1 - l)) & 1 for l in range(depth)]
        target1[0, j] = float(sum(bits))
        for l in range(depth):
            k = j >> (depth - l)
            m = (2 ** l - 1) + k
            route1[m, j] = 1.0 if bits[l] == 1 else -1.0
    route_bd = np.zeros((tree_block * Mp, tree_block * L), dtype=np.float32)
    for b in range(tree_block):
        route_bd[b * Mp:(b + 1) * Mp, b * L:(b + 1) * L] = route1
    target_hi = np.tile(target1, (1, tree_block)) - 0.5   # pre-shifted target

    return (jnp.asarray(fs_b), jnp.asarray(thr_b), jnp.asarray(lv_b),
            jnp.asarray(route_bd, dtype=jnp.bfloat16),  # exact 0/±1 in bf16
            jnp.asarray(target_hi, dtype=jnp.float32),
            feat_idx, thr, leaf_path)


def reference_decision_function(x, feat_idx, thr, leaf_path, c_psi, offset):
    """Pure-numpy tree traversal reference."""
    x = np.asarray(x)
    N = x.shape[0]
    T, M = feat_idx.shape
    depth = int(np.log2(M + 1))
    depths = np.zeros(N, dtype=np.float64)
    for t in range(T):
        leaf = np.zeros(N, dtype=np.int64)
        for l in range(depth):
            m = (2 ** l - 1) + leaf
            f = feat_idx[t, m]
            go_right = x[np.arange(N), f] > thr[t, m]
            leaf = leaf * 2 + go_right.astype(np.int64)
        depths += leaf_path[t, leaf]
    scores = 2.0 ** (-depths / (T * c_psi))
    return (-scores - offset).astype(np.float32)


if __name__ == "__main__":
    # Small, deterministic example consistent with sklearn's (n_samples, n_features)
    N, D = 16, 8
    N_ESTIMATORS = 100        # matches the module default
    DEPTH = 6                 # fixed-depth complete isolation trees (synthetic)
    TREE_BLOCK = _default_tree_block()   # 4 on v6e/v7x, 2 on v5e
    PSI = 256                 # sklearn default max_samples cap
    C_PSI = float(average_path_length(PSI))
    # TODO(synk): sklearn's offset_ for contamination=0.1 is a percentile of the
    # training scores (data-dependent); we use the "auto" convention offset_=-0.5.
    OFFSET = -0.5

    x = jax.random.normal(jax.random.PRNGKey(0), (N, D), dtype=jnp.float32)
    (fs, thr_p, lv_p, route_bd, tgt_hi,
     feat_idx_np, thr_np, leaf_path_np) = build_forest(
        jax.random.PRNGKey(42), N_ESTIMATORS, D, DEPTH, TREE_BLOCK)

    out = isolation_forest_decision_function(
        x, fs, thr_p, lv_p, route_bd, tgt_hi,
        n_trees=N_ESTIMATORS, c_psi=C_PSI, offset=OFFSET)
    out = jax.block_until_ready(out)

    ref = reference_decision_function(np.asarray(x), feat_idx_np, thr_np,
                                      leaf_path_np, C_PSI, OFFSET)
    np.testing.assert_allclose(np.asarray(out), ref, rtol=1e-4, atol=1e-5)
    assert out.shape == (N,) and out.dtype == jnp.float32
    print("KERNEL_OK")
</pallas_src>

<mosaic_0001>
module attributes {stable_mosaic.version = 11 : i64} {
  func.func @iforest_kernel(%arg0: i32, %arg1: memref<8x8xf32, #tpu.memory_space<vmem>>, %arg2: memref<25x8x256xf32, #tpu.memory_space<vmem>>, %arg3: memref<25x1x256xf32, #tpu.memory_space<vmem>>, %arg4: memref<25x1x256xf32, #tpu.memory_space<vmem>>, %arg5: memref<256x256xbf16, #tpu.memory_space<vmem>>, %arg6: memref<1x256xf32, #tpu.memory_space<vmem>>, %arg7: memref<8x1xf32, #tpu.memory_space<vmem>>, %arg8: memref<8x256xf32, #tpu.memory_space<vmem>>) attributes {dimension_semantics = [#tpu.dimension_semantics<parallel>], iteration_bounds = array<i64: 2>, scalar_prefetch = 0 : i64, scratch_operands = 1 : i64, tpu.core_type = #tpu.core_type<tc>, window_params = [{transform_indices = @transform_0, window_bounds = array<i64: 8, 8>}, {pipeline_mode = #tpu.pipeline_mode<synchronous>, transform_indices = @transform_1, window_bounds = array<i64: 25, 8, 256>}, {pipeline_mode = #tpu.pipeline_mode<synchronous>, transform_indices = @transform_2, window_bounds = array<i64: 25, 1, 256>}, {pipeline_mode = #tpu.pipeline_mode<synchronous>, transform_indices = @transform_3, window_bounds = array<i64: 25, 1, 256>}, {pipeline_mode = #tpu.pipeline_mode<synchronous>, transform_indices = @transform_4, window_bounds = array<i64: 256, 256>}, {pipeline_mode = #tpu.pipeline_mode<synchronous>, transform_indices = @transform_5, window_bounds = array<i64: 1, 256>}, {transform_indices = @transform_6, window_bounds = array<i64: 8, 1>}]} {
    %c0 = arith.constant 0 : index
    %c0_0 = arith.constant 0 : index
    %0 = vector.load %arg1[%c0, %c0_0] : memref<8x8xf32, #tpu.memory_space<vmem>>, vector<8x8xf32>
    %c0_1 = arith.constant 0 : index
    %c0_2 = arith.constant 0 : index
    %1 = vector.load %arg5[%c0_1, %c0_2] : memref<256x256xbf16, #tpu.memory_space<vmem>>, vector<256x256xbf16>
    %c0_3 = arith.constant 0 : index
    %c0_4 = arith.constant 0 : index
    %2 = vector.load %arg6[%c0_3, %c0_4] : memref<1x256xf32, #tpu.memory_space<vmem>>, vector<1x256xf32>
    %cst = arith.constant 0.000000e+00 : f32
    %3 = vector.broadcast %cst : f32 to vector<8x256xf32>
    %c0_5 = arith.constant 0 : index
    %c0_6 = arith.constant 0 : index
    %4 = vector.load %arg8[%c0_5, %c0_6] : memref<8x256xf32, #tpu.memory_space<vmem>>, vector<8x256xf32>
    tpu.vector_store %arg8[%c0_5, %c0_6], %3 {strides = array<i32>} : memref<8x256xf32, #tpu.memory_space<vmem>>, vector<8x256xf32>,
    %c0_i32 = arith.constant 0 : i32
    %c5_i32 = arith.constant 5 : i32
    %5 = arith.addi %c0_i32, %c5_i32 : i32
    %c1_i32 = arith.constant 1 : i32
    scf.for %arg9 = %c0_i32 to %5 step %c1_i32  : i32 {
      %c1_i32_16 = arith.constant 1 : i32
      %17 = arith.muli %arg9, %c1_i32_16 : i32
      %c0_i32_17 = arith.constant 0 : i32
      %18 = arith.addi %c0_i32_17, %17 : i32
      %c5_i32_18 = arith.constant 5 : i32
      %19 = arith.muli %18, %c5_i32_18 : i32
      %c0_i32_19 = arith.constant 0 : i32
      %20 = arith.addi %19, %c0_i32_19 : i32
      %21 = arith.index_cast %20 : i32 to index
      %c0_20 = arith.constant 0 : index
      %c0_21 = arith.constant 0 : index
      %22 = vector.load %arg2[%21, %c0_20, %c0_21] : memref<25x8x256xf32, #tpu.memory_space<vmem>>, vector<1x8x256xf32>
      %23 = vector.shape_cast %22 : vector<1x8x256xf32> to vector<8x256xf32>
      %24 = arith.index_cast %20 : i32 to index
      %c0_22 = arith.constant 0 : index
      %c0_23 = arith.constant 0 : index
      %25 = vector.load %arg3[%24, %c0_22, %c0_23] : memref<25x1x256xf32, #tpu.memory_space<vmem>>, vector<1x1x256xf32>
      %26 = vector.shape_cast %25 : vector<1x1x256xf32> to vector<1x256xf32>
      %27 = arith.index_cast %20 : i32 to index
      %c0_24 = arith.constant 0 : index
      %c0_25 = arith.constant 0 : index
      %28 = vector.load %arg4[%27, %c0_24, %c0_25] : memref<25x1x256xf32, #tpu.memory_space<vmem>>, vector<1x1x256xf32>
      %29 = vector.shape_cast %28 : vector<1x1x256xf32> to vector<1x256xf32>
      %cst_26 = arith.constant dense<0.000000e+00> : vector<8x256xf32>
      %30 = tpu.matmul %0, %23, %cst_26 {dimension_numbers = #tpu.dot_dimension_numbers<[1], [0], [0], [1], [0, 0, 1, 1], [], []>, precision = #tpu.contract_precision<fp32>} : vector<8x8xf32>, vector<8x256xf32>, vector<8x256xf32> -> vector<8x256xf32>
      %31 = vector.broadcast %26 : vector<1x256xf32> to vector<8x256xf32>
      %32 = arith.cmpf ogt, %30, %31 : vector<8x256xf32>
      %33 = arith.extui %32 : vector<8x256xi1> to vector<8x256xi32>
      %34 = arith.sitofp %33 : vector<8x256xi32> to vector<8x256xf32>
      %35 = arith.truncf %34 : vector<8x256xf32> to vector<8x256xbf16>
      %cst_27 = arith.constant dense<0.000000e+00> : vector<8x256xf32>
      %36 = tpu.matmul %35, %1, %cst_27 {dimension_numbers = #tpu.dot_dimension_numbers<[1], [0], [0], [1], [0, 0, 1, 1], [], []>} : vector<8x256xbf16>, vector<256x256xbf16>, vector<8x256xf32> -> vector<8x256xf32>
      %c0_28 = arith.constant 0 : index
      %c0_29 = arith.constant 0 : index
      %37 = vector.load %arg8[%c0_28, %c0_29] : memref<8x256xf32, #tpu.memory_space<vmem>>, vector<8x256xf32>
      %38 = vector.broadcast %2 : vector<1x256xf32> to vector<8x256xf32>
      %39 = arith.cmpf ogt, %36, %38 : vector<8x256xf32>
      %cst_30 = arith.constant 0.000000e+00 : f32
      %40 = vector.shape_cast %29 : vector<1x256xf32> to vector<1x256xf32>
      %41 = vector.broadcast %40 : vector<1x256xf32> to vector<8x256xf32>
      %42 = vector.broadcast %cst_30 : f32 to vector<8x256xf32>
      %43 = arith.select %39, %41, %42 : vector<8x256xi1>, vector<8x256xf32>
      %44 = arith.addf %37, %43 : vector<8x256xf32>
      %c0_31 = arith.constant 0 : index
      %c0_32 = arith.constant 0 : index
      %45 = vector.load %arg8[%c0_31, %c0_32] : memref<8x256xf32, #tpu.memory_space<vmem>>, vector<8x256xf32>
      tpu.vector_store %arg8[%c0_31, %c0_32], %44 {strides = array<i32>} : memref<8x256xf32, #tpu.memory_space<vmem>>, vector<8x256xf32>,
      %c5_i32_33 = arith.constant 5 : i32
      %46 = arith.muli %18, %c5_i32_33 : i32
      %c1_i32_34 = arith.constant 1 : i32
      %47 = arith.addi %46, %c1_i32_34 : i32
      %48 = arith.index_cast %47 : i32 to index
      %c0_35 = arith.constant 0 : index
      %c0_36 = arith.constant 0 : index
      %49 = vector.load %arg2[%48, %c0_35, %c0_36] : memref<25x8x256xf32, #tpu.memory_space<vmem>>, vector<1x8x256xf32>
      %50 = vector.shape_cast %49 : vector<1x8x256xf32> to vector<8x256xf32>
      %51 = arith.index_cast %47 : i32 to index
      %c0_37 = arith.constant 0 : index
      %c0_38 = arith.constant 0 : index
      %52 = vector.load %arg3[%51, %c0_37, %c0_38] : memref<25x1x256xf32, #tpu.memory_space<vmem>>, vector<1x1x256xf32>
      %53 = vector.shape_cast %52 : vector<1x1x256xf32> to vector<1x256xf32>
      %54 = arith.index_cast %47 : i32 to index
      %c0_39 = arith.constant 0 : index
      %c0_40 = arith.constant 0 : index
      %55 = vector.load %arg4[%54, %c0_39, %c0_40] : memref<25x1x256xf32, #tpu.memory_space<vmem>>, vector<1x1x256xf32>
      %56 = vector.shape_cast %55 : vector<1x1x256xf32> to vector<1x256xf32>
      %cst_41 = arith.constant dense<0.000000e+00> : vector<8x256xf32>
      %57 = tpu.matmul %0, %50, %cst_41 {dimension_numbers = #tpu.dot_dimension_numbers<[1], [0], [0], [1], [0, 0, 1, 1], [], []>, precision = #tpu.contract_precision<fp32>} : vector<8x8xf32>, vector<8x256xf32>, vector<8x256xf32> -> vector<8x256xf32>
      %58 = vector.broadcast %53 : vector<1x256xf32> to vector<8x256xf32>
      %59 = arith.cmpf ogt, %57, %58 : vector<8x256xf32>
      %60 = arith.extui %59 : vector<8x256xi1> to vector<8x256xi32>
      %61 = arith.sitofp %60 : vector<8x256xi32> to vector<8x256xf32>
      %62 = arith.truncf %61 : vector<8x256xf32> to vector<8x256xbf16>
      %cst_42 = arith.constant dense<0.000000e+00> : vector<8x256xf32>
      %63 = tpu.matmul %62, %1, %cst_42 {dimension_numbers = #tpu.dot_dimension_numbers<[1], [0], [0], [1], [0, 0, 1, 1], [], []>} : vector<8x256xbf16>, vector<256x256xbf16>, vector<8x256xf32> -> vector<8x256xf32>
      %c0_43 = arith.constant 0 : index
      %c0_44 = arith.constant 0 : index
      %64 = vector.load %arg8[%c0_43, %c0_44] : memref<8x256xf32, #tpu.memory_space<vmem>>, vector<8x256xf32>
      %65 = vector.broadcast %2 : vector<1x256xf32> to vector<8x256xf32>
      %66 = arith.cmpf ogt, %63, %65 : vector<8x256xf32>
      %cst_45 = arith.constant 0.000000e+00 : f32
      %67 = vector.shape_cast %56 : vector<1x256xf32> to vector<1x256xf32>
      %68 = vector.broadcast %67 : vector<1x256xf32> to vector<8x256xf32>
      %69 = vector.broadcast %cst_45 : f32 to vector<8x256xf32>
      %70 = arith.select %66, %68, %69 : vector<8x256xi1>, vector<8x256xf32>
      %71 = arith.addf %64, %70 : vector<8x256xf32>
      %c0_46 = arith.constant 0 : index
      %c0_47 = arith.constant 0 : index
      %72 = vector.load %arg8[%c0_46, %c0_47] : memref<8x256xf32, #tpu.memory_space<vmem>>, vector<8x256xf32>
      tpu.vector_store %arg8[%c0_46, %c0_47], %71 {strides = array<i32>} : memref<8x256xf32, #tpu.memory_space<vmem>>, vector<8x256xf32>,
      %c5_i32_48 = arith.constant 5 : i32
      %73 = arith.muli %18, %c5_i32_48 : i32
      %c2_i32 = arith.constant 2 : i32
      %74 = arith.addi %73, %c2_i32 : i32
      %75 = arith.index_cast %74 : i32 to index
      %c0_49 = arith.constant 0 : index
      %c0_50 = arith.constant 0 : index
      %76 = vector.load %arg2[%75, %c0_49, %c0_50] : memref<25x8x256xf32, #tpu.memory_space<vmem>>, vector<1x8x256xf32>
      %77 = vector.shape_cast %76 : vector<1x8x256xf32> to vector<8x256xf32>
      %78 = arith.index_cast %74 : i32 to index
      %c0_51 = arith.constant 0 : index
      %c0_52 = arith.constant 0 : index
      %79 = vector.load %arg3[%78, %c0_51, %c0_52] : memref<25x1x256xf32, #tpu.memory_space<vmem>>, vector<1x1x256xf32>
      %80 = vector.shape_cast %79 : vector<1x1x256xf32> to vector<1x256xf32>
      %81 = arith.index_cast %74 : i32 to index
      %c0_53 = arith.constant 0 : index
      %c0_54 = arith.constant 0 : index
      %82 = vector.load %arg4[%81, %c0_53, %c0_54] : memref<25x1x256xf32, #tpu.memory_space<vmem>>, vector<1x1x256xf32>
      %83 = vector.shape_cast %82 : vector<1x1x256xf32> to vector<1x256xf32>
      %cst_55 = arith.constant dense<0.000000e+00> : vector<8x256xf32>
      %84 = tpu.matmul %0, %77, %cst_55 {dimension_numbers = #tpu.dot_dimension_numbers<[1], [0], [0], [1], [0, 0, 1, 1], [], []>, precision = #tpu.contract_precision<fp32>} : vector<8x8xf32>, vector<8x256xf32>, vector<8x256xf32> -> vector<8x256xf32>
      %85 = vector.broadcast %80 : vector<1x256xf32> to vector<8x256xf32>
      %86 = arith.cmpf ogt, %84, %85 : vector<8x256xf32>
      %87 = arith.extui %86 : vector<8x256xi1> to vector<8x256xi32>
      %88 = arith.sitofp %87 : vector<8x256xi32> to vector<8x256xf32>
      %89 = arith.truncf %88 : vector<8x256xf32> to vector<8x256xbf16>
      %cst_56 = arith.constant dense<0.000000e+00> : vector<8x256xf32>
      %90 = tpu.matmul %89, %1, %cst_56 {dimension_numbers = #tpu.dot_dimension_numbers<[1], [0], [0], [1], [0, 0, 1, 1], [], []>} : vector<8x256xbf16>, vector<256x256xbf16>, vector<8x256xf32> -> vector<8x256xf32>
      %c0_57 = arith.constant 0 : index
      %c0_58 = arith.constant 0 : index
      %91 = vector.load %arg8[%c0_57, %c0_58] : memref<8x256xf32, #tpu.memory_space<vmem>>, vector<8x256xf32>
      %92 = vector.broadcast %2 : vector<1x256xf32> to vector<8x256xf32>
      %93 = arith.cmpf ogt, %90, %92 : vector<8x256xf32>
      %cst_59 = arith.constant 0.000000e+00 : f32
      %94 = vector.shape_cast %83 : vector<1x256xf32> to vector<1x256xf32>
      %95 = vector.broadcast %94 : vector<1x256xf32> to vector<8x256xf32>
      %96 = vector.broadcast %cst_59 : f32 to vector<8x256xf32>
      %97 = arith.select %93, %95, %96 : vector<8x256xi1>, vector<8x256xf32>
      %98 = arith.addf %91, %97 : vector<8x256xf32>
      %c0_60 = arith.constant 0 : index
      %c0_61 = arith.constant 0 : index
      %99 = vector.load %arg8[%c0_60, %c0_61] : memref<8x256xf32, #tpu.memory_space<vmem>>, vector<8x256xf32>
      tpu.vector_store %arg8[%c0_60, %c0_61], %98 {strides = array<i32>} : memref<8x256xf32, #tpu.memory_space<vmem>>, vector<8x256xf32>,
      %c5_i32_62 = arith.constant 5 : i32
      %100 = arith.muli %18, %c5_i32_62 : i32
      %c3_i32 = arith.constant 3 : i32
      %101 = arith.addi %100, %c3_i32 : i32
      %102 = arith.index_cast %101 : i32 to index
      %c0_63 = arith.constant 0 : index
      %c0_64 = arith.constant 0 : index
      %103 = vector.load %arg2[%102, %c0_63, %c0_64] : memref<25x8x256xf32, #tpu.memory_space<vmem>>, vector<1x8x256xf32>
      %104 = vector.shape_cast %103 : vector<1x8x256xf32> to vector<8x256xf32>
      %105 = arith.index_cast %101 : i32 to index
      %c0_65 = arith.constant 0 : index
      %c0_66 = arith.constant 0 : index
      %106 = vector.load %arg3[%105, %c0_65, %c0_66] : memref<25x1x256xf32, #tpu.memory_space<vmem>>, vector<1x1x256xf32>
      %107 = vector.shape_cast %106 : vector<1x1x256xf32> to vector<1x256xf32>
      %108 = arith.index_cast %101 : i32 to index
      %c0_67 = arith.constant 0 : index
      %c0_68 = arith.constant 0 : index
      %109 = vector.load %arg4[%108, %c0_67, %c0_68] : memref<25x1x256xf32, #tpu.memory_space<vmem>>, vector<1x1x256xf32>
      %110 = vector.shape_cast %109 : vector<1x1x256xf32> to vector<1x256xf32>
      %cst_69 = arith.constant dense<0.000000e+00> : vector<8x256xf32>
      %111 = tpu.matmul %0, %104, %cst_69 {dimension_numbers = #tpu.dot_dimension_numbers<[1], [0], [0], [1], [0, 0, 1, 1], [], []>, precision = #tpu.contract_precision<fp32>} : vector<8x8xf32>, vector<8x256xf32>, vector<8x256xf32> -> vector<8x256xf32>
      %112 = vector.broadcast %107 : vector<1x256xf32> to vector<8x256xf32>
      %113 = arith.cmpf ogt, %111, %112 : vector<8x256xf32>
      %114 = arith.extui %113 : vector<8x256xi1> to vector<8x256xi32>
      %115 = arith.sitofp %114 : vector<8x256xi32> to vector<8x256xf32>
      %116 = arith.truncf %115 : vector<8x256xf32> to vector<8x256xbf16>
      %cst_70 = arith.constant dense<0.000000e+00> : vector<8x256xf32>
      %117 = tpu.matmul %116, %1, %cst_70 {dimension_numbers = #tpu.dot_dimension_numbers<[1], [0], [0], [1], [0, 0, 1, 1], [], []>} : vector<8x256xbf16>, vector<256x256xbf16>, vector<8x256xf32> -> vector<8x256xf32>
      %c0_71 = arith.constant 0 : index
      %c0_72 = arith.constant 0 : index
      %118 = vector.load %arg8[%c0_71, %c0_72] : memref<8x256xf32, #tpu.memory_space<vmem>>, vector<8x256xf32>
      %119 = vector.broadcast %2 : vector<1x256xf32> to vector<8x256xf32>
      %120 = arith.cmpf ogt, %117, %119 : vector<8x256xf32>
      %cst_73 = arith.constant 0.000000e+00 : f32
      %121 = vector.shape_cast %110 : vector<1x256xf32> to vector<1x256xf32>
      %122 = vector.broadcast %121 : vector<1x256xf32> to vector<8x256xf32>
      %123 = vector.broadcast %cst_73 : f32 to vector<8x256xf32>
      %124 = arith.select %120, %122, %123 : vector<8x256xi1>, vector<8x256xf32>
      %125 = arith.addf %118, %124 : vector<8x256xf32>
      %c0_74 = arith.constant 0 : index
      %c0_75 = arith.constant 0 : index
      %126 = vector.load %arg8[%c0_74, %c0_75] : memref<8x256xf32, #tpu.memory_space<vmem>>, vector<8x256xf32>
      tpu.vector_store %arg8[%c0_74, %c0_75], %125 {strides = array<i32>} : memref<8x256xf32, #tpu.memory_space<vmem>>, vector<8x256xf32>,
      %c5_i32_76 = arith.constant 5 : i32
      %127 = arith.muli %18, %c5_i32_76 : i32
      %c4_i32 = arith.constant 4 : i32
      %128 = arith.addi %127, %c4_i32 : i32
      %129 = arith.index_cast %128 : i32 to index
      %c0_77 = arith.constant 0 : index
      %c0_78 = arith.constant 0 : index
      %130 = vector.load %arg2[%129, %c0_77, %c0_78] : memref<25x8x256xf32, #tpu.memory_space<vmem>>, vector<1x8x256xf32>
      %131 = vector.shape_cast %130 : vector<1x8x256xf32> to vector<8x256xf32>
      %132 = arith.index_cast %128 : i32 to index
      %c0_79 = arith.constant 0 : index
      %c0_80 = arith.constant 0 : index
      %133 = vector.load %arg3[%132, %c0_79, %c0_80] : memref<25x1x256xf32, #tpu.memory_space<vmem>>, vector<1x1x256xf32>
      %134 = vector.shape_cast %133 : vector<1x1x256xf32> to vector<1x256xf32>
      %135 = arith.index_cast %128 : i32 to index
      %c0_81 = arith.constant 0 : index
      %c0_82 = arith.constant 0 : index
      %136 = vector.load %arg4[%135, %c0_81, %c0_82] : memref<25x1x256xf32, #tpu.memory_space<vmem>>, vector<1x1x256xf32>
      %137 = vector.shape_cast %136 : vector<1x1x256xf32> to vector<1x256xf32>
      %cst_83 = arith.constant dense<0.000000e+00> : vector<8x256xf32>
      %138 = tpu.matmul %0, %131, %cst_83 {dimension_numbers = #tpu.dot_dimension_numbers<[1], [0], [0], [1], [0, 0, 1, 1], [], []>, precision = #tpu.contract_precision<fp32>} : vector<8x8xf32>, vector<8x256xf32>, vector<8x256xf32> -> vector<8x256xf32>
      %139 = vector.broadcast %134 : vector<1x256xf32> to vector<8x256xf32>
      %140 = arith.cmpf ogt, %138, %139 : vector<8x256xf32>
      %141 = arith.extui %140 : vector<8x256xi1> to vector<8x256xi32>
      %142 = arith.sitofp %141 : vector<8x256xi32> to vector<8x256xf32>
      %143 = arith.truncf %142 : vector<8x256xf32> to vector<8x256xbf16>
      %cst_84 = arith.constant dense<0.000000e+00> : vector<8x256xf32>
      %144 = tpu.matmul %143, %1, %cst_84 {dimension_numbers = #tpu.dot_dimension_numbers<[1], [0], [0], [1], [0, 0, 1, 1], [], []>} : vector<8x256xbf16>, vector<256x256xbf16>, vector<8x256xf32> -> vector<8x256xf32>
      %c0_85 = arith.constant 0 : index
      %c0_86 = arith.constant 0 : index
      %145 = vector.load %arg8[%c0_85, %c0_86] : memref<8x256xf32, #tpu.memory_space<vmem>>, vector<8x256xf32>
      %146 = vector.broadcast %2 : vector<1x256xf32> to vector<8x256xf32>
      %147 = arith.cmpf ogt, %144, %146 : vector<8x256xf32>
      %cst_87 = arith.constant 0.000000e+00 : f32
      %148 = vector.shape_cast %137 : vector<1x256xf32> to vector<1x256xf32>
      %149 = vector.broadcast %148 : vector<1x256xf32> to vector<8x256xf32>
      %150 = vector.broadcast %cst_87 : f32 to vector<8x256xf32>
      %151 = arith.select %147, %149, %150 : vector<8x256xi1>, vector<8x256xf32>
      %152 = arith.addf %145, %151 : vector<8x256xf32>
      %c0_88 = arith.constant 0 : index
      %c0_89 = arith.constant 0 : index
      %153 = vector.load %arg8[%c0_88, %c0_89] : memref<8x256xf32, #tpu.memory_space<vmem>>, vector<8x256xf32>
      tpu.vector_store %arg8[%c0_88, %c0_89], %152 {strides = array<i32>} : memref<8x256xf32, #tpu.memory_space<vmem>>, vector<8x256xf32>,
    }
    %c5_i32_7 = arith.constant 5 : i32
    %c0_8 = arith.constant 0 : index
    %c0_9 = arith.constant 0 : index
    %6 = vector.load %arg8[%c0_8, %c0_9] : memref<8x256xf32, #tpu.memory_space<vmem>>, vector<8x256xf32>
    %cst_10 = arith.constant dense<0.000000e+00> : vector<8xf32>
    %7 = vector.multi_reduction <add>, %6, %cst_10 [1] : vector<8x256xf32> to vector<8xf32>
    %8 = vector.shape_cast %7 : vector<8xf32> to vector<8x1xf32>
    %cst_11 = arith.constant -9.76107724E-4 : f32
    %9 = vector.broadcast %cst_11 : f32 to vector<8x1xf32>
    %10 = arith.mulf %8, %9 : vector<8x1xf32>
    %11 = math.exp2 %10 : vector<8x1xf32>
    %cst_12 = arith.constant 0.000000e+00 : f32
    %12 = vector.broadcast %cst_12 : f32 to vector<8x1xf32>
    %13 = arith.subf %12, %11 : vector<8x1xf32>
    %cst_13 = arith.constant -5.000000e-01 : f32
    %14 = vector.broadcast %cst_13 : f32 to vector<8x1xf32>
    %15 = arith.subf %13, %14 : vector<8x1xf32>
    %c0_14 = arith.constant 0 : index
    %c0_15 = arith.constant 0 : index
    %16 = vector.load %arg7[%c0_14, %c0_15] : memref<8x1xf32, #tpu.memory_space<vmem>>, vector<8x1xf32>
    tpu.vector_store %arg7[%c0_14, %c0_15], %15 {strides = array<i32>} : memref<8x1xf32, #tpu.memory_space<vmem>>, vector<8x1xf32>,
    return
  }
  func.func @transform_0(%arg0: i32) -> (i32, i32) {
    %c0_i32 = arith.constant 0 : i32
    %c0_i32_0 = arith.constant 0 : i32
    return %arg0, %c0_i32 : i32, i32
  }
  func.func @transform_1(%arg0: i32) -> (i32, i32, i32) {
    %c0_i32 = arith.constant 0 : i32
    %c0_i32_0 = arith.constant 0 : i32
    %c0_i32_1 = arith.constant 0 : i32
    %c0_i32_2 = arith.constant 0 : i32
    return %c0_i32, %c0_i32_0, %c0_i32_1 : i32, i32, i32
  }
  func.func @transform_2(%arg0: i32) -> (i32, i32, i32) {
    %c0_i32 = arith.constant 0 : i32
    %c0_i32_0 = arith.constant 0 : i32
    %c0_i32_1 = arith.constant 0 : i32
    %c0_i32_2 = arith.constant 0 : i32
    return %c0_i32, %c0_i32_0, %c0_i32_1 : i32, i32, i32
  }
  func.func @transform_3(%arg0: i32) -> (i32, i32, i32) {
    %c0_i32 = arith.constant 0 : i32
    %c0_i32_0 = arith.constant 0 : i32
    %c0_i32_1 = arith.constant 0 : i32
    %c0_i32_2 = arith.constant 0 : i32
    return %c0_i32, %c0_i32_0, %c0_i32_1 : i32, i32, i32
  }
  func.func @transform_4(%arg0: i32) -> (i32, i32) {
    %c0_i32 = arith.constant 0 : i32
    %c0_i32_0 = arith.constant 0 : i32
    %c0_i32_1 = arith.constant 0 : i32
    return %c0_i32, %c0_i32_0 : i32, i32
  }
  func.func @transform_5(%arg0: i32) -> (i32, i32) {
    %c0_i32 = arith.constant 0 : i32
    %c0_i32_0 = arith.constant 0 : i32
    %c0_i32_1 = arith.constant 0 : i32
    return %c0_i32, %c0_i32_0 : i32, i32
  }
  func.func @transform_6(%arg0: i32) -> (i32, i32) {
    %c0_i32 = arith.constant 0 : i32
    %c0_i32_0 = arith.constant 0 : i32
    return %arg0, %c0_i32 : i32, i32
  }
}

</mosaic_0001>

<bundles_post_ra>
// kernel: tpu_custom_call.1
= control target key start
LH: loop header
LB: loop body
LE: loop exit
PB: predicated region body
PF: predicated region fallthrough
CT: control target
= control target key end

     0   :  { %11 = vsyncpa [#allocation4], 0  ;;  %s4596_s0 = inlined_call_operand.vmem [shape: f32[16,8], index: 0, kind: input, shape index: {}]   ;;  %s4597_s1 = inlined_call_operand.hbm [shape: f32[25,8,256], index: 1, kind: input, shape index: {}]   ;;  %s4598_s2 = inlined_call_operand.hbm [shape: f32[25,1,256], index: 2, kind: input, shape index: {}]   ;;  %s4599_s3 = inlined_call_operand.hbm [shape: f32[25,1,256], index: 3, kind: input, shape index: {}]   ;;  %s4600_s4 = inlined_call_operand.hbm [shape: bf16[256,256], index: 4, kind: input, shape index: {}]   ;;  %s4601_s5 = inlined_call_operand.vmem [shape: f32[1,256], index: 5, kind: input, shape index: {}]   ;;  %s4602_s6 = inlined_call_operand.vmem [shape: f32[16,1], index: 6, kind: output, shape index: {}]  }
   0x1   :  { %12 = vsyncpa [#allocation6], 0 }
   0x2   :  { %13 = vsyncpa [#allocation9], 0  ;;  %s3884_s21 = smov 0  }
   0x3 LB: > { %s3836_s22 = smov [#allocation5]   ;;  %s3890_s24 = sadd.s32 4294967295, %s3830_s21   ;;  %s3830_s21 = sphi %s3884_s21, %s19_s21  }
   0x4   : > { %s206_s23 = sshll.u32 %s3836_s22, 4  ;;  %p3469_p0 = scmp.ge.s32.totalorder %s3830_s21, 1  ;;  %s3895_s23 = int_to_ptr.vmem [resolvable:$true] %s206_s23 }
   0x5   : > { %p181_p1 = scmp.lt.s32.totalorder %s3830_s21, 3  ;;  %p4603_p2 = scmp.eq.s32.totalorder %s3890_s24, 0 }
   0x6   : > { %s3837_s26 = smov [#allocation3]   ;;  %s3838_s29 = smov [#allocation7]  }
   0x7   : > { %p3897_p3 = pnand %p3469_p0, %p181_p1  ;;  %s193_s27 = sshll.u32 %s3837_s26, 4  ;;  %s3903_s27 = int_to_ptr.vmem [resolvable:$true] %s193_s27 }
   0x8   : > { %s3911_s30 = sshll.u32 %s3838_s29, 4  ;;  %s3696_s9 = scalar_lea.hbm %s4598_s2, 800  ;;  %s220_s30 = int_to_ptr.vmem [resolvable:$true] %s3911_s30 }
   0x9   : > { %s4642_s25 = scalar_select %p3897_p3, 1, 0 }
   0xa   : > { %p3644_p4 = pneg %p3897_p3  ;;  %p3697_p6 = scmp.ne.s32.totalorder %s4598_s2, %s3696_s9 }
   0xb   : > { %p3703_p10 = scmp.lt.u32.totalorder %s3696_s9, %s4598_s2 }
   0xc   : > { %p3907_p5 = pnand %p4603_p2, %p3644_p4 }
   0xe   : > { %p3921_p7 = pneg %p3907_p5 }
  0x10   : > { %p3699_p8 = pnand %p3921_p7, %p3697_p6 }
  0x12   : > { %p3700_p9 = pneg %p3699_p8 }
  0x14   : > { %p3705_p11 = pnand %p3703_p10, %p3700_p9 }
  0x16   : > { %3708 = shalt.err (!%p3705_p11)
}
  0x17   : > { %s3709_s15 = scalar_lea.vmem %s3895_s23, 800  ;;  %p3717_p1 = scmp.lt.s32.totalorder %s3895_s23, %s3895_s23 }
  0x18   : > { %p3710_p12 = scmp.ne.s32.totalorder %s3895_s23, %s3709_s15  ;;  %p3718_p4 = scmp.lt.s32.totalorder %s3709_s15, %s3709_s15 }
  0x1a   : > { %p3712_p13 = pnand %p3710_p12, %p3921_p7  ;;  %p3719_p6 = por %p3718_p4, %p3717_p1 }
  0x1c   : > { %p3713_p0 = pneg %p3712_p13 }
  0x1e   : > { %p3720_p8 = pnand %p3719_p6, %p3713_p0 }
  0x20   : > { %3723 = shalt.err (!%p3720_p8)
}
  0x21   : > { %s3839_s16 = smov 32   ;;  %s3840_s17 = smov 2  }
  0x22   : > { %3650 = dma.hbm_to_vmem [thread:$0]  (!%p3907_p5), %s4598_s2, 800, %s3895_s23, [#allocation6], %s3839_s16, %s3839_s16, %s3840_s17  }
  0x23   : > { %s3724_s26 = scalar_lea.hbm %s4597_s1, 6400 }
  0x24   : > { %p3725_p9 = scmp.ne.s32.totalorder %s4597_s1, %s3724_s26  ;;  %p3731_p12 = scmp.lt.u32.totalorder %s3724_s26, %s4597_s1 }
  0x26   : > { %p3727_p10 = pnand %p3725_p9, %p3921_p7 }
  0x28   : > { %p3728_p11 = pneg %p3727_p10 }
  0x2a   : > { %p3733_p13 = pnand %p3731_p12, %p3728_p11 }
  0x2c   : > { %3736 = shalt.err (!%p3733_p13)
}
  0x2d   : > { %s3737_s23 = scalar_lea.vmem %s3903_s27, 6400  ;;  %p3745_p6 = scmp.lt.s32.totalorder %s3903_s27, %s3903_s27 }
  0x2e   : > { %p3738_p0 = scmp.ne.s32.totalorder %s3903_s27, %s3737_s23  ;;  %p3746_p8 = scmp.lt.s32.totalorder %s3737_s23, %s3737_s23 }
  0x30   : > { %p3740_p1 = pnand %p3738_p0, %p3921_p7  ;;  %p3747_p9 = por %p3746_p8, %p3745_p6 }
  0x32   : > { %p3741_p4 = pneg %p3740_p1 }
  0x34   : > { %p3748_p10 = pnand %p3747_p9, %p3741_p4 }
  0x36   : > { %3751 = shalt.err (!%p3748_p10)
}
  0x37   : > { %s3841_s10 = smov 256   ;;  %s3842_s11 = smov 16  }
  0x38   : > { %3647 = dma.hbm_to_vmem [thread:$0]  (!%p3907_p5), %s4597_s1, 6400, %s3903_s27, [#allocation4], %s3841_s10, %s3841_s10, %s3842_s11  }
  0x39   : > { %s3843_s15 = smov [#allocation8]   ;;  %s3752_s22 = scalar_lea.hbm %s4599_s3, 800 }
  0x3a   : > { %s232_s18 = sshll.u32 %s3843_s15, 4  ;;  %p3753_p11 = scmp.ne.s32.totalorder %s4599_s3, %s3752_s22  ;;  %s233_s18 = int_to_ptr.vmem [resolvable:$true] %s232_s18 }
  0x3b   : > { %p3759_p0 = scmp.lt.u32.totalorder %s3752_s22, %s4599_s3 }
  0x3c   : > { %p3755_p12 = pnand %p3753_p11, %p3921_p7 }
  0x3e   : > { %p3756_p13 = pneg %p3755_p12 }
  0x40   : > { %p3761_p1 = pnand %p3759_p0, %p3756_p13 }
  0x42   : > { %3764 = shalt.err (!%p3761_p1)
}
  0x43   : > { %s3765_s27 = scalar_lea.vmem %s220_s30, 800  ;;  %p3773_p9 = scmp.lt.s32.totalorder %s220_s30, %s220_s30 }
  0x44   : > { %p3766_p4 = scmp.ne.s32.totalorder %s220_s30, %s3765_s27  ;;  %p3774_p10 = scmp.lt.s32.totalorder %s3765_s27, %s3765_s27 }
  0x46   : > { %p3768_p6 = pnand %p3766_p4, %p3921_p7  ;;  %p3775_p2 = por %p3774_p10, %p3773_p9 }
  0x48   : > { %p3769_p8 = pneg %p3768_p6 }
  0x4a   : > { %p3776_p3 = pnand %p3775_p2, %p3769_p8 }
  0x4c   : > { %3779 = shalt.err (!%p3776_p3)
}
  0x4d   : > { %3653 = dma.hbm_to_vmem [thread:$0]  (!%p3907_p5), %s4599_s3, 800, %s220_s30, [#allocation6], %s3839_s16, %s3839_s16, %s3840_s17  }
  0x4e   : > { %s3780_s13 = scalar_lea.hbm %s4600_s4, 4096 }
  0x4f   : > { %p3781_p2 = scmp.ne.s32.totalorder %s4600_s4, %s3780_s13  ;;  %p3787_p12 = scmp.lt.u32.totalorder %s3780_s13, %s4600_s4 }
  0x51   : > { %p3783_p3 = pnand %p3781_p2, %p3921_p7 }
  0x53   : > { %p3784_p11 = pneg %p3783_p3 }
  0x55   : > { %p3789_p13 = pnand %p3787_p12, %p3784_p11 }
  0x57   : > { %3792 = shalt.err (!%p3789_p13)
}
  0x58   : > { %s3793_s22 = scalar_lea.vmem %s233_s18, 4096  ;;  %p3801_p6 = scmp.lt.s32.totalorder %s233_s18, %s233_s18 }
  0x59   : > { %p3794_p0 = scmp.ne.s32.totalorder %s233_s18, %s3793_s22  ;;  %p3802_p8 = scmp.lt.s32.totalorder %s3793_s22, %s3793_s22 }
  0x5b   : > { %p3796_p1 = pnand %p3794_p0, %p3921_p7  ;;  %p3803_p9 = por %p3802_p8, %p3801_p6 }
  0x5d   : > { %p3797_p4 = pneg %p3796_p1 }
  0x5f   : > { %p3804_p10 = pnand %p3803_p9, %p3797_p4 }
  0x61   : > { %3807 = shalt.err (!%p3804_p10)
}
  0x62   : > { %s3844_s30 = smov 128   ;;  %s3845_s16 = smov 8  }
  0x63   : > { %3656 = dma.hbm_to_vmem [thread:$0]  (!%p3907_p5), %s4600_s4, 4096, %s233_s18, [#allocation9], %s3844_s30, %s3844_s30, %s3845_s16  }
  0x64   : > { %p4645_p2 = scmp.ne.s32.totalorder %s4642_s25, 0 }
  0x66   : > { %258 = sbr.rel (%p4645_p2) target bundleno = 1370 (0x55a), region = 44 }
  0x6d   : > { %p4646_p3 = scmp.eq.s32.totalorder %s3890_s24, 0 }
  0x6f   : > { %3817 = dma.done.wait (%p4646_p3), [#allocation4], 6400   ;;  %p4647_p7 = pmov %p4646_p3 }
  0x70   : > { %p4648_p11 = pmov %p4646_p3 }
  0x71   : > { %3819 = vsyncadd (%p4647_p7), [#allocation4], 4294960896 }
  0x72   : > { %3821 = dma.done.wait (%p4648_p11), [#allocation6], 1600   ;;  %p4649_p12 = pmov %p4646_p3 }
  0x73   : > { %p4650_p13 = pmov %p4646_p3 }
  0x74   : > { %3823 = vsyncadd (%p4649_p12), [#allocation6], 4294965696 }
  0x75   : > { %3825 = dma.done.wait (%p4650_p13), [#allocation9], 4096   ;;  %p4651_p5 = pmov %p4646_p3 }
  0x76   : > { %p298_p0 = scmp.lt.s32.totalorder %s3890_s24, 1  ;;  %v3846_v0 = vmov 0.0   ;;  %v4034_v2 = vld [vmem:[#allocation8] sm:$0xff]  ;;  %v4036_v3 = vld [vmem:[#allocation8 + $0x8] sm:$0xff]  ;;  %v4038_v4 = vld [vmem:[#allocation8 + $0x10] sm:$0xff]  ;;  %s4103_s9 = smov 0  }
  0x77   : > { %3827 = vsyncadd (%p4651_p5), [#allocation9], 4294963200  ;;  %340 = vst [vmem:[#allocation2] sm:$0xff] %v3846_v0  ;;  %v4040_v5 = vld [vmem:[#allocation8 + $0x18] sm:$0xff]  ;;  %v4042_v6 = vld [vmem:[#allocation8 + $0x20] sm:$0xff] }
  0x78   : > { %341 = vst [vmem:[#allocation2 + $0x8] sm:$0xff] %v3846_v0  ;;  %s4723_s24 = smov (!%p298_p0, %s3890_s24), 1  ;;  %4653 = vst [vmem:[#allocation14_spill] sm:$0xff] %v4034_v2  ;;  %v4044_v7 = vld [vmem:[#allocation8 + $0x28] sm:$0xff]  ;;  %v4046_v8 = vld [vmem:[#allocation8 + $0x30] sm:$0xff] }
  0x79   : > { %s3480_s25 = sshll.u32 %s4723_s24, 3  ;;  %4654 = vst [vmem:[#allocation15_spill] sm:$0xff] %v4036_v3  ;;  %4655 = vst [vmem:[#allocation16_spill] sm:$0xff] %v4038_v4  ;;  %v4048_v9 = vld [vmem:[#allocation8 + $0x38] sm:$0xff]  ;;  %v4050_v10 = vld [vmem:[#allocation8 + $0x40] sm:$0xff] }
  0x7a   : > { %s301_s18 = scalar_lea.vmem %s4596_s0, %s3480_s25  ;;  %s4030_s8 = scalar_lea.vmem %s4602_s6, %s3480_s25  ;;  %4656 = vst [vmem:[#allocation17_spill] sm:$0xff] %v4040_v5  ;;  %4657 = vst [vmem:[#allocation18_spill] sm:$0xff] %v4042_v6  ;;  %v4052_v11 = vld [vmem:[#allocation8 + $0x48] sm:$0xff]  ;;  %v4054_v12 = vld [vmem:[#allocation8 + $0x50] sm:$0xff] }
  0x7b   : > { %v4032_v1 = vld [vmem:[%s301_s18] sm:$0xff]  ;;  %4658 = vst [vmem:[#allocation19_spill] sm:$0xff] %v4044_v7  ;;  %4659 = vst [vmem:[#allocation20_spill] sm:$0xff] %v4046_v8  ;;  %v4060_v15 = vld [vmem:[#allocation8 + $0x68] sm:$0xff] }
  0x7c   : > { %4652 = vst [vmem:[#allocation13_spill] sm:$0xff] %v4032_v1  ;;  %4660 = vst [vmem:[#allocation21_spill] sm:$0xff] %v4048_v9  ;;  %v4056_v13 = vld [vmem:[#allocation8 + $0x58] sm:$0xff]  ;;  %v4058_v14 = vld [vmem:[#allocation8 + $0x60] sm:$0xff] }
  0x7d   : > { %4661 = vst [vmem:[#allocation22_spill] sm:$0xff] %v4050_v10  ;;  %4662 = vst [vmem:[#allocation23_spill] sm:$0xff] %v4052_v11  ;;  %v4062_v16 = vld [vmem:[#allocation8 + $0x70] sm:$0xff]  ;;  %v4064_v17 = vld [vmem:[#allocation8 + $0x78] sm:$0xff] }
  0x7e   : > { %4663 = vst [vmem:[#allocation24_spill] sm:$0xff] %v4054_v12  ;;  %4664 = vst [vmem:[#allocation25_spill] sm:$0xff] %v4056_v13  ;;  %v4066_v18 = vld [vmem:[#allocation8 + $0x80] sm:$0xff]  ;;  %v4068_v19 = vld [vmem:[#allocation8 + $0x88] sm:$0xff] }
  0x7f   : > { %4665 = vst [vmem:[#allocation26_spill] sm:$0xff] %v4058_v14  ;;  %4666 = vst [vmem:[#allocation27_spill] sm:$0xff] %v4060_v15  ;;  %v4070_v20 = vld [vmem:[#allocation8 + $0x90] sm:$0xff]  ;;  %v4072_v21 = vld [vmem:[#allocation8 + $0x98] sm:$0xff] }
  0x80   : > { %4667 = vst [vmem:[#allocation28_spill] sm:$0xff] %v4062_v16  ;;  %4668 = vst [vmem:[#allocation29_spill] sm:$0xff] %v4064_v17  ;;  %v4074_v22 = vld [vmem:[#allocation8 + $0xa0] sm:$0xff]  ;;  %v4076_v23 = vld [vmem:[#allocation8 + $0xa8] sm:$0xff] }
  0x81   : > { %4669 = vst [vmem:[#allocation30_spill] sm:$0xff] %v4066_v18  ;;  %4670 = vst [vmem:[#allocation31_spill] sm:$0xff] %v4068_v19  ;;  %v4078_v24 = vld [vmem:[#allocation8 + $0xb0] sm:$0xff]  ;;  %v4080_v25 = vld [vmem:[#allocation8 + $0xb8] sm:$0xff] }
  0x82   : > { %4671 = vst [vmem:[#allocation32_spill] sm:$0xff] %v4070_v20  ;;  %4672 = vst [vmem:[#allocation33_spill] sm:$0xff] %v4072_v21  ;;  %v4082_v26 = vld [vmem:[#allocation8 + $0xc0] sm:$0xff]  ;;  %v4084_v27 = vld [vmem:[#allocation8 + $0xc8] sm:$0xff] }
  0x83   : > { %4673 = vst [vmem:[#allocation34_spill] sm:$0xff] %v4074_v22  ;;  %4674 = vst [vmem:[#allocation35_spill] sm:$0xff] %v4076_v23  ;;  %v4086_v28 = vld [vmem:[#allocation8 + $0xd0] sm:$0xff]  ;;  %v4088_v29 = vld [vmem:[#allocation8 + $0xd8] sm:$0xff] }
  0x84   : > { %4675 = vst [vmem:[#allocation36_spill] sm:$0xff] %v4078_v24  ;;  %4676 = vst [vmem:[#allocation37_spill] sm:$0xff] %v4080_v25  ;;  %v4090_v30 = vld [vmem:[#allocation8 + $0xe0] sm:$0xff]  ;;  %v4092_v31 = vld [vmem:[#allocation8 + $0xe8] sm:$0xff] }
  0x85   : > { %4677 = vst [vmem:[#allocation38_spill] sm:$0xff] %v4082_v26  ;;  %4678 = vst [vmem:[#allocation39_spill] sm:$0xff] %v4084_v27  ;;  %v4094_v32 = vld [vmem:[#allocation8 + $0xf0] sm:$0xff]  ;;  %v4096_v33 = vld [vmem:[#allocation8 + $0xf8] sm:$0xff] }
  0x86   : > { %4679 = vst [vmem:[#allocation40_spill] sm:$0xff] %v4086_v28  ;;  %4680 = vst [vmem:[#allocation41_spill] sm:$0xff] %v4088_v29  ;;  %v4101_v34 = vld [vmem:[%s4601_s5] sm:$0x3] }
  0x87   : > { %4681 = vst [vmem:[#allocation42_spill] sm:$0xff] %v4090_v30  ;;  %4682 = vst [vmem:[#allocation43_spill] sm:$0xff] %v4092_v31 }
  0x88   : > { %4683 = vst [vmem:[#allocation44_spill] sm:$0xff] %v4094_v32  ;;  %4684 = vst [vmem:[#allocation45_spill] sm:$0xff] %v4096_v33 }
  0x89   : > { %4685 = vst [vmem:[#allocation46_spill] sm:$0xff] %v4101_v34 }
  0x8a LB: >> { %v4697_v23 = vld [vmem:[#allocation35_spill] sm:$0xff]  ;;  %v4698_v22 = vld [vmem:[#allocation34_spill] sm:$0xff]  ;;  %v4699_v21 = vld [vmem:[#allocation33_spill] sm:$0xff]  ;;  %vm358_vm0 = vcmask 64512   ;;  %v4605_v35 = vmov 0.0   ;;  %s3577_s23 = smul.u32 80, %s3834_s9  ;;  %s3834_s9 = sphi %s4103_s9, %s347_s9  }
  0x8b   : >> { %v4695_v25 = vld [vmem:[#allocation37_spill] sm:$0xff]  ;;  %v4696_v24 = vld [vmem:[#allocation36_spill] sm:$0xff]  ;;  %v4701_v19 = vld [vmem:[#allocation31_spill] sm:$0xff]  ;;  %514 = vmatprep.mubr.f32.mxu0 %v4605_v35  ;;  %428 = vmatprep.mubr.f32.mxu1 %v4605_v35  ;;  %s3482_s11 = smul.u32 10, %s3834_s9  ;;  %s347_s9 = sadd.s32 1, %s3834_s9  }
  0x8c   : >> { %v4693_v27 = vld [vmem:[#allocation39_spill] sm:$0xff]  ;;  %v4694_v26 = vld [vmem:[#allocation38_spill] sm:$0xff]  ;;  %v4700_v20 = vld [vmem:[#allocation32_spill] sm:$0xff]  ;;  %s4117_s10 = scalar_lea.vmem [#allocation3], %s3577_s23  ;;  %p344_p1 = scmp.ge.s32.totalorder %s347_s9, 5  }
  0x8d   : >> { %v4691_v29 = vld [vmem:[#allocation41_spill] sm:$0xff]  ;;  %v4692_v28 = vld [vmem:[#allocation40_spill] sm:$0xff]  ;;  %v4702_v18 = vld [vmem:[#allocation30_spill] sm:$0xff]  ;;  %s4372_s13 = scalar_lea.vmem [#allocation5], %s3482_s11  ;;  %s4485_s14 = scalar_lea.vmem [#allocation7], %s3482_s11 }
  0x8e   : >> { %v4689_v31 = vld [vmem:[#allocation43_spill] sm:$0xff]  ;;  %v4690_v30 = vld [vmem:[#allocation42_spill] sm:$0xff]  ;;  %v4703_v17 = vld [vmem:[#allocation29_spill] sm:$0xff] }
  0x8f   : >> { %v4687_v33 = vld [vmem:[#allocation45_spill] sm:$0xff]  ;;  %v4688_v32 = vld [vmem:[#allocation44_spill] sm:$0xff]  ;;  %v4705_v15 = vld [vmem:[#allocation27_spill] sm:$0xff] }
  0x90   : >> { %v4686_v34 = vld [vmem:[#allocation46_spill] sm:$0xff]  ;;  %v4704_v16 = vld [vmem:[#allocation28_spill] sm:$0xff]  ;;  %v4707_v13 = vld [vmem:[#allocation25_spill] sm:$0xff] }
  0x91   : >> { %v4706_v14 = vld [vmem:[#allocation26_spill] sm:$0xff]  ;;  %v4708_v12 = vld [vmem:[#allocation24_spill] sm:$0xff]  ;;  %v4709_v11 = vld [vmem:[#allocation23_spill] sm:$0xff] }
  0x92   : >> { %v4710_v10 = vld [vmem:[#allocation22_spill] sm:$0xff]  ;;  %v4711_v9 = vld [vmem:[#allocation21_spill] sm:$0xff]  ;;  %v4712_v8 = vld [vmem:[#allocation20_spill] sm:$0xff]  ;;  %v4187_v0 = vcombine.high %v4708_v12, %v4707_v13 }
  0x93   : >> { %v4713_v7 = vld [vmem:[#allocation19_spill] sm:$0xff]  ;;  %v4714_v6 = vld [vmem:[#allocation18_spill] sm:$0xff]  ;;  %v4715_v5 = vld [vmem:[#allocation17_spill] sm:$0xff]  ;;  %v4164_v60 = vcombine.high %v4712_v8, %v4711_v9  ;;  %v4171_v61 = vcombine.low %v4712_v8, %v4711_v9  ;;  %v4176_v62 = vcombine.high %v4710_v10, %v4709_v11  ;;  %v4181_v63 = vcombine.low %v4710_v10, %v4709_v11 }
  0x94   : >> { %v4716_v4 = vld [vmem:[#allocation16_spill] sm:$0xff]  ;;  %v4717_v3 = vld [vmem:[#allocation15_spill] sm:$0xff]  ;;  %v4718_v2 = vld [vmem:[#allocation14_spill] sm:$0xff]  ;;  %v4154_v58 = vcombine.high %v4714_v6, %v4713_v7  ;;  %v4159_v59 = vcombine.low %v4714_v6, %v4713_v7  ;;  %v4258_v6 = vcombine.low %v4698_v22, %v4697_v23  ;;  %v4264_v7 = vcombine.high %v4696_v24, %v4695_v25 }
  0x95   : >> { %v4719_v1 = vld [vmem:[#allocation13_spill] sm:$0xff]  ;;  %v4128_v44 = vcombine.high %v4718_v2, %v4717_v3  ;;  %v4136_v48 = vcombine.low %v4718_v2, %v4717_v3  ;;  %v4143_v52 = vcombine.high %v4716_v4, %v4715_v5  ;;  %v4149_v55 = vcombine.low %v4716_v4, %v4715_v5 }
  0x96   : >> { %v360_v36 = vsel %vm358_vm0, %v4719_v1, 0  ;;  %v353_v39 = vld [vmem:[%s4117_s10 + $0x8] sm:$0xff]  ;;  %v352_v40 = vld [vmem:[%s4117_s10] sm:$0xff]  ;;  %v4720_v1 = vmov 0.0   ;;  %v4248_v3 = vcombine.low %v4700_v20, %v4699_v21  ;;  %v4253_v4 = vcombine.high %v4698_v22, %v4697_v23 }
  0x97   : >> { %v4112_v37 = vand.u32 4294901760, %v360_v36  ;;  %v362_v41 = vand.u32 4294901760, %v353_v39  ;;  %v4121_v42 = vand.u32 4294901760, %v352_v40  ;;  %v4277_v9 = vcombine.high %v4694_v26, %v4693_v27 }
  0x99   : >> { %v4115_v38 = vsub.f32 %v360_v36, %v4112_v37  ;;  %v441_v45 = vsub.f32 %v353_v39, %v362_v41  ;;  %v447_v46 = vsub.f32 %v352_v40, %v4121_v42  ;;  %363 = vmatprep.subr.mxu1 %v362_v41  ;;  %v3524_v36 = vld [vmem:[%s4117_s10 + $0x18] sm:$0xff]  ;;  %v4195_v39 = vcombine.low %v4708_v12, %v4707_v13 }
  0x9a   : >> { %365 = vmatpush1.msra.mxu1 %v4121_v42  ;;  %v4200_v40 = vcombine.high %v4706_v14, %v4705_v15  ;;  %v828_v12 = vlaneseq }
  0x9b   : >> { %v4124_v43 = vand.u32 4294901760, %v4115_v38  ;;  %v442_v49 = vand.u32 4294901760, %v441_v45  ;;  %v448_v50 = vand.u32 4294901760, %v447_v46  ;;  %1006 = vmatprep.subr.bf16.mxu1 %v4128_v44 }
  0x9c   : >> { %v829_v13 = vshrl.u32 %v828_v12, 7  ;;  %v4628_v12 = vmov 1.0|1.0  }
  0x9d   : >> { %v432_v47 = vsub.f32 %v4115_v38, %v4124_v43  ;;  %v443_v53 = vsub.f32 %v441_v45, %v442_v49  ;;  %v449_v54 = vsub.f32 %v447_v46, %v448_v50 }
  0x9f   : >> { %v4138_v51 = vand.u32 4294901760, %v432_v47  ;;  %v444_v56 = vand.u32 4294901760, %v443_v53  ;;  %v450_v57 = vand.u32 4294901760, %v449_v54  ;;  %v4208_v47 = vcombine.low %v4706_v14, %v4705_v15  ;;  %v355_v15 = vld [vmem:[%s4372_s13] sm:$0x3] }
  0xa0   : >> { %v4368_v14 = vsub.s32 0, %v829_v13 }
  0xa1   : >> { %434 = vmatmul.mubr.f32.vlgmr.msra.gmra.mrb[0].mxu1 %v4138_v51  ;;  %445 = vmatprep.subr.mxu0 %v444_v56  ;;  %v4223_v56 = vcombine.low %v4704_v16, %v4703_v17 }
  0xa2   : >> { %1007 = vmatpush1.bf16.msra.mxu1 %v4136_v48  ;;  %451 = vmatpush1.msra.mxu0 %v450_v57  ;;  %v4228_v57 = vcombine.high %v4702_v18, %v4701_v19 }
  0xa3   : >> { %1008 = vmatprep.subr.bf16.mxu1 %v4143_v52  ;;  %516 = vmatmul.mubr.f32.vlgmr.msra.gmra.mrb[0].mxu0 %v4112_v37 }
  0xa4   : >> { %524 = vmatprep.subr.mxu0 %v441_v45  ;;  %590 = vmatprep.mubr.f32.mxu0 %v4605_v35  ;;  %v4202_v45 = vand.u32 4294901760, %v3524_v36 }
  0xa5   : >> { %527 = vmatpush1.msra.mxu0 %v447_v46  ;;  %v3523_v46 = vld [vmem:[%s4117_s10 + $0x10] sm:$0xff] }
  0xa6   : >> { %1009 = vmatpush1.bf16.msra.mxu1 %v4149_v55  ;;  %600 = vmatprep.subr.mxu0 %v362_v41  ;;  %v4217_v53 = vand.u32 4294901760, %v3523_v46  ;;  %v1168_v54 = vsub.f32 %v3524_v36, %v4202_v45  ;;  %v4240_v36 = vcombine.high %v4700_v20, %v4699_v21 }
  0xa7   : >> { %1010 = vmatprep.subr.bf16.mxu1 %v4154_v58 }
  0xaa   : >> { %1011 = vmatpush1.bf16.msra.mxu1 %v4159_v59 }
  0xab   : >> { %1012 = vmatprep.subr.bf16.mxu1 %v4164_v60  ;;  %593 = vmatmul.mubr.f32.vlgmr.msra.gmra.mrb[0].mxu0 %v4115_v38 }
  0xac   : >> { %602 = vmatpush1.msra.mxu0 %v4121_v42  ;;  %665 = vmatprep.mubr.f32.mxu0 %v4605_v35 }
  0xad   : >> { %678 = vmatprep.subr.mxu0 %v442_v49  ;;  %v4214_v49 = vcombine.high %v4704_v16, %v4703_v17  ;;  %v4375_v16 = vsub.s32 1, %v829_v13  ;;  %v831_v17 = vrot.slane %v355_v15, %v4368_v14  ;;  %v3526_v13 = vld [vmem:[%s4372_s13 + $0x2] sm:$0x3] }
  0xae   : >> { %1013 = vmatpush1.bf16.msra.mxu1 %v4171_v61 }
  0xaf   : >> { %1014 = vmatprep.subr.bf16.mxu1 %v4176_v62 }
  0xb2   : >> { %1015 = vmatpush1.bf16.msra.mxu1 %v4181_v63 }
  0xb3   : >> { %1016 = vmatprep.subr.bf16.mxu1 %v4187_v0  ;;  %669 = vmatmul.mubr.f32.vlgmr.msra.gmra.mrb[0].mxu0 %v4124_v43 }
  0xb4   : >> { %682 = vmatpush1.msra.mxu0 %v448_v50  ;;  %745 = vmatprep.mubr.f32.mxu0 %v4605_v35  ;;  %v1174_v50 = vsub.f32 %v3523_v46, %v4217_v53  ;;  %v1169_v35 = vand.u32 4294901760, %v1168_v54 }
  0xb5   : >> { %754 = vmatprep.subr.mxu0 %v362_v41  ;;  %v4234_v41 = vcombine.low %v4702_v18, %v4701_v19  ;;  %v835_v19 = vrot.slane %v355_v15, %v4375_v16 }
  0xb6   : >> { %1017 = vmatpush1.bf16.msra.mxu1 %v4195_v39  ;;  %v1175_v46 = vand.u32 4294901760, %v1174_v50  ;;  %v1170_v2 = vsub.f32 %v1168_v54, %v1169_v35 }
  0xb7   : >> { %1018 = vmatprep.subr.bf16.mxu1 %v4200_v40 }
  0xb8   : >> { %v1176_v5 = vsub.f32 %v1174_v50, %v1175_v46 }
  0xba   : >> { %1019 = vmatpush1.bf16.msra.mxu1 %v4208_v47  ;;  %v1177_v8 = vand.u32 4294901760, %v1176_v5  ;;  %v4283_v5 = vcombine.low %v4694_v26, %v4693_v27 }
  0xbb   : >> { %1020 = vmatprep.subr.bf16.mxu1 %v4214_v49  ;;  %747 = vmatmul.mubr.f32.vlgmr.msra.gmra.mrb[0].mxu0 %v4112_v37 }
  0xbc   : >> { %756 = vmatpush1.msra.mxu0 %v4121_v42  ;;  %819 = vmatprep.mubr.f32.mxu0 %v4720_v1  ;;  %v1171_v42 = vand.u32 4294901760, %v1170_v2  ;;  %v4271_v2 = vcombine.low %v4696_v24, %v4695_v25  ;;  %v4721_v24 = vmov 1.0|1.0  }
  0xbd   : >> { %1090 = vmatprep.subr.mxu0 %v4202_v45 }
  0xbe   : >> { %1021 = vmatpush1.bf16.msra.mxu1 %v4223_v56 }
  0xbf   : >> { %1022 = vmatprep.subr.bf16.mxu1 %v4228_v57 }
  0xc2   : >> { %1023 = vmatpush1.bf16.msra.mxu1 %v4234_v41 }
  0xc3   : >> { %1024 = vmatprep.subr.bf16.mxu1 %v4240_v36  ;;  %821 = vmatmul.mubr.f32.vlgmr.msra.gmra.mrb[0].mxu0 %v4112_v37 }
  0xc4   : >> { %1092 = vmatpush1.msra.mxu0 %v4217_v53  ;;  %1155 = vmatprep.mubr.f32.mxu0 %v4720_v1 }
  0xc5   : >> { %1172 = vmatprep.subr.mxu0 %v1171_v42  ;;  %v4288_v42 = vcombine.high %v4692_v28, %v4691_v29 }
  0xc6   : >> { %1025 = vmatpush1.bf16.msra.mxu1 %v4248_v3 }
  0xc7   : >> { %1026 = vmatprep.subr.bf16.mxu1 %v4253_v4  ;;  %1161 = vmatmul.mubr.f32.vlgmr.msra.gmra.mrb[2].mxu0 %v4138_v51 }
  0xc8   : >> { %1178 = vmatpush1.msra.mxu0 %v1177_v8  ;;  %1241 = vmatprep.mubr.f32.mxu0 %v4720_v1  ;;  %v4293_v8 = vcombine.low %v4692_v28, %v4691_v29 }
  0xc9   : >> { %1251 = vmatprep.subr.mxu0 %v1168_v54  ;;  %v4299_v54 = vcombine.high %v4690_v30, %v4689_v31 }
  0xca   : >> { %1027 = vmatpush1.bf16.msra.mxu1 %v4258_v6 }
  0xcb   : >> { %1028 = vmatprep.subr.bf16.mxu1 %v4264_v7 }
  0xce   : >> { %1029 = vmatpush1.bf16.msra.mxu1 %v4271_v2 }
  0xcf   : >> { %1030 = vmatprep.subr.bf16.mxu1 %v4277_v9  ;;  %1243 = vmatmul.mubr.f32.vlgmr.msra.gmra.mrb[2].mxu0 %v4112_v37 }
  0xd0   : >> { %1254 = vmatpush1.msra.mxu0 %v1174_v50  ;;  %1317 = vmatprep.mubr.f32.mxu0 %v4720_v1  ;;  %v3537_v50 = vld [vmem:[%s4117_s10 + $0x28] sm:$0xff] }
  0xd1   : >> { %1327 = vmatprep.subr.mxu0 %v4202_v45 }
  0xd2   : >> { %1031 = vmatpush1.bf16.msra.mxu1 %v4283_v5 }
  0xd3   : >> { %1032 = vmatprep.subr.bf16.mxu1 %v4288_v42 }
  0xd6   : >> { %1033 = vmatpush1.bf16.msra.mxu1 %v4293_v8 }
  0xd7   : >> { %1034 = vmatprep.subr.bf16.mxu1 %v4299_v54  ;;  %1320 = vmatmul.mubr.f32.vlgmr.msra.gmra.mrb[2].mxu0 %v4115_v38 }
  0xd8   : >> { %1329 = vmatpush1.msra.mxu0 %v4217_v53  ;;  %1392 = vmatprep.mubr.f32.mxu0 %v4720_v1 }
  0xd9   : >> { %1405 = vmatprep.subr.mxu0 %v1169_v35  ;;  %v4336_v35 = vcombine.low %v4690_v30, %v4689_v31 }
  0xdb   : >> { %1035 = vmatpush1.bf16.msra.mxu1 %v4336_v35 }
  0xdf   : >> { %1396 = vmatmul.mubr.f32.vlgmr.msra.gmra.mrb[2].mxu0 %v4124_v43 }
  0xe0   : >> { %1409 = vmatpush1.msra.mxu0 %v1175_v46  ;;  %1472 = vmatprep.mubr.f32.mxu0 %v4720_v1  ;;  %v4364_v46 = vand.u32 4294901760, %v3537_v50 }
  0xe1   : >> { %1481 = vmatprep.subr.mxu0 %v4202_v45  ;;  %v4343_v45 = vcombine.high %v4688_v32, %v4687_v33 }
  0xe3   : >> { %1036 = vmatprep.subr.bf16.mxu1 %v4343_v45 }
  0xe7   : >> { %1474 = vmatmul.mubr.f32.vlgmr.msra.gmra.mrb[2].mxu0 %v4112_v37 }
  0xe8   : >> { %1483 = vmatpush1.msra.mxu0 %v4217_v53  ;;  %1546 = vmatprep.mubr.f32.mxu0 %v4720_v1  ;;  %v4347_v53 = vcombine.low %v4688_v32, %v4687_v33 }
  0xe9   : >> { %1573 = vmatprep.subr.bf16.mxu0 %v4128_v44 }
  0xea   : >> { %1037 = vmatpush1.bf16.msra.mxu1 %v4347_v53 }
  0xeb   : >> { %2129 = vmatprep.subr.bf16.mxu1 %v4128_v44 }
  0xef   : >> { %1548 = vmatmul.mubr.f32.vlgmr.msra.gmra.mrb[2].mxu0 %v4112_v37 }
  0xf0   : >> { %1574 = vmatpush1.bf16.msra.mxu0 %v4136_v48 }
  0xf1   : >> { %1575 = vmatprep.subr.bf16.mxu0 %v4143_v52 }
  0xf4   : >> { %1576 = vmatpush1.bf16.msra.mxu0 %v4149_v55 }
  0xf5   : >> { %1577 = vmatprep.subr.bf16.mxu0 %v4154_v58 }
  0xf8   : >> { %1578 = vmatpush1.bf16.msra.mxu0 %v4159_v59 }
  0xf9   : >> { %1579 = vmatprep.subr.bf16.mxu0 %v4164_v60 }
  0xfc   : >> { %1580 = vmatpush1.bf16.msra.mxu0 %v4171_v61 }
  0xfd   : >> { %1581 = vmatprep.subr.bf16.mxu0 %v4176_v62 }
 0x100   : >> { %1582 = vmatpush1.bf16.msra.mxu0 %v4181_v63 }
 0x101   : >> { %1583 = vmatprep.subr.bf16.mxu0 %v4187_v0 }
 0x104   : >> { %1584 = vmatpush1.bf16.msra.mxu0 %v4195_v39 }
 0x105   : >> { %1585 = vmatprep.subr.bf16.mxu0 %v4200_v40 }
 0x108   : >> { %1586 = vmatpush1.bf16.msra.mxu0 %v4208_v47 }
 0x109   : >> { %1587 = vmatprep.subr.bf16.mxu0 %v4214_v49 }
 0x10c   : >> { %1588 = vmatpush1.bf16.msra.mxu0 %v4223_v56 }
 0x10d   : >> { %1589 = vmatprep.subr.bf16.mxu0 %v4228_v57 }
 0x110   : >> { %1590 = vmatpush1.bf16.msra.mxu0 %v4234_v41 }
 0x111   : >> { %1591 = vmatprep.subr.bf16.mxu0 %v4240_v36 }
 0x114   : >> { %1592 = vmatpush1.bf16.msra.mxu0 %v4248_v3 }
 0x115   : >> { %1593 = vmatprep.subr.bf16.mxu0 %v4253_v4 }
 0x118   : >> { %1594 = vmatpush1.bf16.msra.mxu0 %v4258_v6 }
 0x119   : >> { %1595 = vmatprep.subr.bf16.mxu0 %v4264_v7 }
 0x11c   : >> { %1596 = vmatpush1.bf16.msra.mxu0 %v4271_v2 }
 0x11d   : >> { %1597 = vmatprep.subr.bf16.mxu0 %v4277_v9 }
 0x120   : >> { %1598 = vmatpush1.bf16.msra.mxu0 %v4283_v5 }
 0x121   : >> { %1599 = vmatprep.subr.bf16.mxu0 %v4288_v42 }
 0x124   : >> { %1600 = vmatpush1.bf16.msra.mxu0 %v4293_v8 }
 0x125   : >> { %1601 = vmatprep.subr.bf16.mxu0 %v4299_v54 }
 0x128   : >> { %1602 = vmatpush1.bf16.msra.mxu0 %v4336_v35 }
 0x129   : >> { %1603 = vmatprep.subr.bf16.mxu0 %v4343_v45 }
 0x12c   : >> { %1604 = vmatpush1.bf16.msra.mxu0 %v4347_v53 }
 0x12d   : >> { %1646 = vmatprep.subr.mxu0 %v4364_v46 }
 0x174   : >> { %v435_v10 = vpop.f32.mrb[0].mxu1 }
 0x175   : >> { %v437_v11 = vpop.f32.mrb[1].mxu1 }
 0x196   : >> { %v822_v18 = vpop.f32.mrb[0].mxu0 }
 0x197   : >> { %v3578_v20 = vadd.f32 %v822_v18, %v435_v10  ;;  %v824_v21 = vpop.f32.mrb[1].mxu0  ;;  %v3536_v10 = vld [vmem:[%s4117_s10 + $0x20] sm:$0xff]  ;;  %v1558_v18 = vrot.slane %v3526_v13, %v4368_v14 }
 0x198   : >> { %v3579_v22 = vadd.f32 %v824_v21, %v437_v11  ;;  %v1724_v11 = vsub.f32 %v3537_v50, %v4364_v46  ;;  %v1647_v15 = vand.u32 4294901760, %v3536_v10 }
 0x199   : >> { %vm838_vm1 = vcmp.gt.f32.partialorder %v3578_v20, %v831_v17 }
 0x19a   : >> { %vm839_vm2 = vcmp.gt.f32.partialorder %v3579_v22, %v835_v19  ;;  %vm3520_vm4 = vmpackc.low %vm838_vm1, %vm838_vm1  ;;  %v1725_v17 = vand.u32 4294901760, %v1724_v11  ;;  %v1562_v19 = vrot.slane %v3526_v13, %v4375_v16  ;;  %v1730_v20 = vsub.f32 %v3536_v10, %v1647_v15 }
 0x19b   : >> { %vm3518_vm3 = vmpackc.low %vm839_vm2, %vm839_vm2 }
 0x19c   : >> { %3519 = vmatprep.mubr.msk.bf16.mxu1 %vm3518_vm3, %v4628_v12  ;;  %v1726_v21 = vsub.f32 %v1724_v11, %v1725_v17 }
 0x19d   : >> { %3521 = vmatmul.mubr.msk.bf16.vlgmr.msra.gmra.mrb[4].mxu1 %vm3520_vm4, %v4628_v12  ;;  %v1731_v12 = vand.u32 4294901760, %v1730_v20 }
 0x19e   : >> { %2130 = vmatpush1.bf16.msra.mxu1 %v4136_v48  ;;  %v1727_v23 = vand.u32 4294901760, %v1726_v21 }
 0x19f   : >> { %2131 = vmatprep.subr.bf16.mxu1 %v4143_v52  ;;  %v1732_v10 = vsub.f32 %v1730_v20, %v1731_v12 }
 0x1a1   : >> { %v1733_v13 = vand.u32 4294901760, %v1732_v10 }
 0x1a2   : >> { %2132 = vmatpush1.bf16.msra.mxu1 %v4149_v55 }
 0x1a3   : >> { %2133 = vmatprep.subr.bf16.mxu1 %v4154_v58 }
 0x1a6   : >> { %2134 = vmatpush1.bf16.msra.mxu1 %v4159_v59 }
 0x1a7   : >> { %2135 = vmatprep.subr.bf16.mxu1 %v4164_v60 }
 0x1aa   : >> { %2136 = vmatpush1.bf16.msra.mxu1 %v4171_v61 }
 0x1ab   : >> { %2137 = vmatprep.subr.bf16.mxu1 %v4176_v62 }
 0x1ae   : >> { %2138 = vmatpush1.bf16.msra.mxu1 %v4181_v63 }
 0x1af   : >> { %2139 = vmatprep.subr.bf16.mxu1 %v4187_v0 }
 0x1b2   : >> { %2140 = vmatpush1.bf16.msra.mxu1 %v4195_v39 }
 0x1b3   : >> { %2141 = vmatprep.subr.bf16.mxu1 %v4200_v40 }
 0x1b6   : >> { %2142 = vmatpush1.bf16.msra.mxu1 %v4208_v47 }
 0x1b7   : >> { %2143 = vmatprep.subr.bf16.mxu1 %v4214_v49 }
 0x1ba   : >> { %2144 = vmatpush1.bf16.msra.mxu1 %v4223_v56 }
 0x1bb   : >> { %2145 = vmatprep.subr.bf16.mxu1 %v4228_v57 }
 0x1be   : >> { %2146 = vmatpush1.bf16.msra.mxu1 %v4234_v41 }
 0x1bf   : >> { %2147 = vmatprep.subr.bf16.mxu1 %v4240_v36 }
 0x1c2   : >> { %v1549_v22 = vpop.f32.mrb[2].mxu0  ;;  %2148 = vmatpush1.bf16.msra.mxu1 %v4248_v3 }
 0x1c3   : >> { %vm1565_vm5 = vcmp.gt.f32.partialorder %v1549_v22, %v1558_v18  ;;  %v1551_v50 = vpop.f32.mrb[3].mxu0  ;;  %2149 = vmatprep.subr.bf16.mxu1 %v4253_v4  ;;  %v3549_v18 = vld [vmem:[%s4117_s10 + $0x30] sm:$0xff] }
 0x1c4   : >> { %vm1566_vm6 = vcmp.gt.f32.partialorder %v1551_v50, %v1562_v19  ;;  %vm3533_vm8 = vmpackc.low %vm1565_vm5, %vm1565_vm5  ;;  %v2203_v19 = vand.u32 4294901760, %v3549_v18 }
 0x1c5   : >> { %vm3531_vm7 = vmpackc.low %vm1566_vm6, %vm1566_vm6 }
 0x1c6   : >> { %3532 = vmatprep.mubr.msk.bf16.mxu0 %vm3531_vm7, %v4721_v24  ;;  %2150 = vmatpush1.bf16.msra.mxu1 %v4258_v6  ;;  %v2286_v21 = vsub.f32 %v3549_v18, %v2203_v19 }
 0x1c7   : >> { %3534 = vmatmul.mubr.msk.bf16.vlgmr.msra.gmra.mrb[4].mxu0 %vm3533_vm8, %v4721_v24  ;;  %2151 = vmatprep.subr.bf16.mxu1 %v4264_v7 }
 0x1c8   : >> { %1648 = vmatpush1.msra.mxu0 %v1647_v15  ;;  %1711 = vmatprep.mubr.f32.mxu0 %v4720_v1 }
 0x1c9   : >> { %1728 = vmatprep.subr.mxu0 %v1727_v23  ;;  %v3550_v23 = vld [vmem:[%s4117_s10 + $0x38] sm:$0xff] }
 0x1ca   : >> { %2152 = vmatpush1.bf16.msra.mxu1 %v4271_v2 }
 0x1cb   : >> { %2153 = vmatprep.subr.bf16.mxu1 %v4277_v9 }
 0x1ce   : >> { %2154 = vmatpush1.bf16.msra.mxu1 %v4283_v5 }
 0x1cf   : >> { %1717 = vmatmul.mubr.f32.vlgmr.msra.gmra.mrb[8].mxu0 %v4138_v51  ;;  %2155 = vmatprep.subr.bf16.mxu1 %v4288_v42 }
 0x1d0   : >> { %1734 = vmatpush1.msra.mxu0 %v1733_v13  ;;  %1797 = vmatprep.mubr.f32.mxu0 %v4720_v1 }
 0x1d1   : >> { %1807 = vmatprep.subr.mxu0 %v1724_v11  ;;  %v2201_v11 = vand.u32 4294901760, %v3550_v23 }
 0x1d2   : >> { %2156 = vmatpush1.bf16.msra.mxu1 %v4293_v8 }
 0x1d3   : >> { %2157 = vmatprep.subr.bf16.mxu1 %v4299_v54 }
 0x1d6   : >> { %2158 = vmatpush1.bf16.msra.mxu1 %v4336_v35 }
 0x1d7   : >> { %1799 = vmatmul.mubr.f32.vlgmr.msra.gmra.mrb[8].mxu0 %v4112_v37  ;;  %2159 = vmatprep.subr.bf16.mxu1 %v4343_v45 }
 0x1d8   : >> { %1810 = vmatpush1.msra.mxu0 %v1730_v20  ;;  %1873 = vmatprep.mubr.f32.mxu0 %v4720_v1  ;;  %v2280_v20 = vsub.f32 %v3550_v23, %v2201_v11 }
 0x1d9   : >> { %1883 = vmatprep.subr.mxu0 %v4364_v46 }
 0x1da   : >> { %2160 = vmatpush1.bf16.msra.mxu1 %v4347_v53  ;;  %v2281_v22 = vand.u32 4294901760, %v2280_v20 }
 0x1dc   : >> { %v2282_v50 = vsub.f32 %v2280_v20, %v2281_v22 }
 0x1de   : >> { %v2283_v13 = vand.u32 4294901760, %v2282_v50 }
 0x1df   : >> { %1876 = vmatmul.mubr.f32.vlgmr.msra.gmra.mrb[8].mxu0 %v4115_v38 }
 0x1e0   : >> { %1885 = vmatpush1.msra.mxu0 %v1647_v15  ;;  %1948 = vmatprep.mubr.f32.mxu0 %v4720_v1 }
 0x1e1   : >> { %1961 = vmatprep.subr.mxu0 %v1725_v17  ;;  %v2287_v17 = vand.u32 4294901760, %v2286_v21 }
 0x1e3   : >> { %v2288_v10 = vsub.f32 %v2286_v21, %v2287_v17 }
 0x1e7   : >> { %1952 = vmatmul.mubr.f32.vlgmr.msra.gmra.mrb[8].mxu0 %v4124_v43 }
 0x1e8   : >> { %1965 = vmatpush1.msra.mxu0 %v1731_v12  ;;  %2028 = vmatprep.mubr.f32.mxu0 %v4720_v1  ;;  %v2289_v12 = vand.u32 4294901760, %v2288_v10  ;;  %v3528_v10 = vld [vmem:[%s4485_s14 + $0x2] sm:$0x3] }
 0x1e9   : >> { %2037 = vmatprep.subr.mxu0 %v4364_v46  ;;  %v3563_v46 = vld [vmem:[%s4117_s10 + $0x48] sm:$0xff]  ;;  %v1626_v26 = vrot.slane %v3528_v10, %v4375_v16 }
 0x1ef   : >> { %2030 = vmatmul.mubr.f32.vlgmr.msra.gmra.mrb[8].mxu0 %v4112_v37 }
 0x1f0   : >> { %2039 = vmatpush1.msra.mxu0 %v1647_v15  ;;  %2102 = vmatprep.mubr.f32.mxu0 %v4720_v1  ;;  %v4471_v15 = vand.u32 4294901760, %v3563_v46 }
 0x1f1   : >> { %2202 = vmatprep.subr.mxu0 %v2201_v11 }
 0x1f2   : >> { %2758 = vmatprep.subr.mxu1 %v4471_v15  ;;  %v2836_v33 = vsub.f32 %v3563_v46, %v4471_v15 }
 0x1f7   : >> { %2104 = vmatmul.mubr.f32.vlgmr.msra.gmra.mrb[8].mxu0 %v4112_v37 }
 0x1f8   : >> { %2204 = vmatpush1.msra.mxu0 %v2203_v19  ;;  %2267 = vmatprep.mubr.f32.mxu0 %v4720_v1 }
 0x1f9   : >> { %2284 = vmatprep.subr.mxu0 %v2283_v13  ;;  %v1047_v13 = vld [vmem:[#allocation2] sm:$0xff] }
 0x1fb   : >> { %2273 = vmatmul.mubr.f32.vlgmr.msra.gmra.mrb[10].mxu0 %v4138_v51 }
 0x1fc   : >> { %2290 = vmatpush1.msra.mxu0 %v2289_v12  ;;  %2353 = vmatprep.mubr.f32.mxu0 %v4720_v1 }
 0x1fd   : >> { %2363 = vmatprep.subr.mxu0 %v2280_v20  ;;  %v357_v20 = vld [vmem:[%s4485_s14] sm:$0x3] }
 0x1fe   : >> { %v1070_v50 = vrot.slane %v357_v20, %v4375_v16 }
 0x203   : >> { %2355 = vmatmul.mubr.f32.vlgmr.msra.gmra.mrb[10].mxu0 %v4112_v37 }
 0x204   : >> { %2366 = vmatpush1.msra.mxu0 %v2286_v21  ;;  %2429 = vmatprep.mubr.f32.mxu0 %v4720_v1  ;;  %v4490_v21 = vrot.slane %v4686_v34, %v4368_v14 }
 0x205   : >> { %2439 = vmatprep.subr.mxu0 %v2201_v11 }
 0x20b   : >> { %2432 = vmatmul.mubr.f32.vlgmr.msra.gmra.mrb[10].mxu0 %v4115_v38 }
 0x20c   : >> { %2441 = vmatpush1.msra.mxu0 %v2203_v19  ;;  %2504 = vmatprep.mubr.f32.mxu0 %v4720_v1 }
 0x20d   : >> { %2517 = vmatprep.subr.mxu0 %v2281_v22  ;;  %v4494_v22 = vrot.slane %v4686_v34, %v4375_v16 }
 0x213   : >> { %2508 = vmatmul.mubr.f32.vlgmr.msra.gmra.mrb[10].mxu0 %v4124_v43 }
 0x214   : >> { %2521 = vmatpush1.msra.mxu0 %v2287_v17  ;;  %2584 = vmatprep.mubr.f32.mxu0 %v4720_v1  ;;  %v1066_v17 = vrot.slane %v357_v20, %v4368_v14 }
 0x215   : >> { %2593 = vmatprep.subr.mxu0 %v2201_v11 }
 0x21b   : >> { %2586 = vmatmul.mubr.f32.vlgmr.msra.gmra.mrb[10].mxu0 %v4112_v37 }
 0x21c   : >> { %2595 = vmatpush1.msra.mxu0 %v2203_v19  ;;  %2658 = vmatprep.mubr.f32.mxu0 %v4720_v1 }
 0x21d   : >> { %2685 = vmatprep.subr.bf16.mxu0 %v4128_v44 }
 0x223   : >> { %2660 = vmatmul.mubr.f32.vlgmr.msra.gmra.mrb[10].mxu0 %v4112_v37 }
 0x224   : >> { %2686 = vmatpush1.bf16.msra.mxu0 %v4136_v48 }
 0x225   : >> { %2687 = vmatprep.subr.bf16.mxu0 %v4143_v52 }
 0x228   : >> { %2688 = vmatpush1.bf16.msra.mxu0 %v4149_v55 }
 0x229   : >> { %2689 = vmatprep.subr.bf16.mxu0 %v4154_v58 }
 0x22c   : >> { %2690 = vmatpush1.bf16.msra.mxu0 %v4159_v59 }
 0x22d   : >> { %2691 = vmatprep.subr.bf16.mxu0 %v4164_v60 }
 0x230   : >> { %2692 = vmatpush1.bf16.msra.mxu0 %v4171_v61 }
 0x231   : >> { %2693 = vmatprep.subr.bf16.mxu0 %v4176_v62 }
 0x234   : >> { %2694 = vmatpush1.bf16.msra.mxu0 %v4181_v63 }
 0x235   : >> { %2695 = vmatprep.subr.bf16.mxu0 %v4187_v0 }
 0x238   : >> { %2696 = vmatpush1.bf16.msra.mxu0 %v4195_v39 }
 0x239   : >> { %2697 = vmatprep.subr.bf16.mxu0 %v4200_v40 }
 0x23c   : >> { %2698 = vmatpush1.bf16.msra.mxu0 %v4208_v47 }
 0x23d   : >> { %2699 = vmatprep.subr.bf16.mxu0 %v4214_v49 }
 0x240   : >> { %2700 = vmatpush1.bf16.msra.mxu0 %v4223_v56 }
 0x241   : >> { %2701 = vmatprep.subr.bf16.mxu0 %v4228_v57 }
 0x244   : >> { %2702 = vmatpush1.bf16.msra.mxu0 %v4234_v41 }
 0x245   : >> { %2703 = vmatprep.subr.bf16.mxu0 %v4240_v36 }
 0x248   : >> { %2704 = vmatpush1.bf16.msra.mxu0 %v4248_v3 }
 0x249   : >> { %2705 = vmatprep.subr.bf16.mxu0 %v4253_v4 }
 0x24c   : >> { %2706 = vmatpush1.bf16.msra.mxu0 %v4258_v6 }
 0x24d   : >> { %2707 = vmatprep.subr.bf16.mxu0 %v4264_v7 }
 0x250   : >> { %2708 = vmatpush1.bf16.msra.mxu0 %v4271_v2 }
 0x251   : >> { %2709 = vmatprep.subr.bf16.mxu0 %v4277_v9 }
 0x254   : >> { %2710 = vmatpush1.bf16.msra.mxu0 %v4283_v5 }
 0x255   : >> { %2711 = vmatprep.subr.bf16.mxu0 %v4288_v42 }
 0x258   : >> { %2712 = vmatpush1.bf16.msra.mxu0 %v4293_v8 }
 0x259   : >> { %2713 = vmatprep.subr.bf16.mxu0 %v4299_v54 }
 0x25c   : >> { %2714 = vmatpush1.bf16.msra.mxu0 %v4336_v35 }
 0x25d   : >> { %2715 = vmatprep.subr.bf16.mxu0 %v4343_v45 }
 0x260   : >> { %2716 = vmatpush1.bf16.msra.mxu0 %v4347_v53 }
 0x270   : >> { %v1040_v23 = vpop.f32.mrb[4].mxu1 }
 0x271   : >> { %v1042_v11 = vpop.f32.mrb[5].mxu1  ;;  %vm1060_vm9 = vcmp.gt.f32.partialorder %v1040_v23, %v4490_v21 }
 0x272   : >> { %v1044_v18 = vpop.f32.mrb[6].mxu1  ;;  %vm1061_vm10 = vcmp.gt.f32.partialorder %v1042_v11, %v4494_v22  ;;  %v1073_v12 = vsel %vm1060_vm9, %v1066_v17, 0.0 }
 0x273   : >> { %v1045_v19 = vpop.f32.mrb[7].mxu1  ;;  %v1622_v18 = vrot.slane %v3528_v10, %v4368_v14  ;;  %v1074_v25 = vsel %vm1061_vm10, %v1070_v50, 0.0  ;;  %v1075_v28 = vadd.f32 %v1073_v12, %v1047_v13  ;;  %v3562_v50 = vld [vmem:[%s4117_s10 + $0x40] sm:$0xff]  ;;  %v2837_v13 = vand.u32 4294901760, %v2836_v33 }
 0x274   : >> { %v1048_v19 = vld [vmem:[#allocation2 + $0x8] sm:$0xff]  ;;  %v3539_v10 = vld [vmem:[%s4372_s13 + $0x4] sm:$0x3]  ;;  %v2759_v34 = vand.u32 4294901760, %v3562_v50 }
 0x275   : >> { %v1076_v29 = vadd.f32 %v1074_v25, %v1048_v19  ;;  %v2118_v25 = vrot.slane %v3539_v10, %v4375_v16 }
 0x276   : >> { %v2842_v12 = vsub.f32 %v3562_v50, %v2759_v34 }
 0x29a   : >> { %v1607_v27 = vpop.f32.mrb[4].mxu0 }
 0x29b   : >> { %vm1616_vm11 = vcmp.gt.f32.partialorder %v1607_v27, %v4490_v21  ;;  %v1609_v23 = vpop.f32.mrb[5].mxu0  ;;  %v2114_v27 = vrot.slane %v3539_v10, %v4368_v14 }
 0x29c   : >> { %v1629_v20 = vsel %vm1616_vm11, %v1622_v18, 0.0  ;;  %vm1617_vm12 = vcmp.gt.f32.partialorder %v1609_v23, %v4494_v22  ;;  %v1611_v11 = vpop.f32.mrb[6].mxu0  ;;  %v2838_v18 = vsub.f32 %v2836_v33, %v2837_v13 }
 0x29d   : >> { %v4505_v30 = vadd.f32 %v1629_v20, %v1075_v28  ;;  %v1630_v17 = vsel %vm1617_vm12, %v1626_v26, 0.0  ;;  %v1612_v31 = vpop.f32.mrb[7].mxu0  ;;  %v2843_v26 = vand.u32 4294901760, %v2842_v12 }
 0x29e   : >> { %v4507_v32 = vadd.f32 %v1630_v17, %v1076_v29  ;;  %v2839_v29 = vand.u32 4294901760, %v2838_v18 }
 0x29f   : >> { %v2844_v31 = vsub.f32 %v2842_v12, %v2843_v26 }
 0x2a1   : >> { %v2845_v46 = vand.u32 4294901760, %v2844_v31 }
 0x2ca   : >> { %v2105_v19 = vpop.f32.mrb[8].mxu0 }
 0x2cb   : >> { %vm2121_vm13 = vcmp.gt.f32.partialorder %v2105_v19, %v2114_v27  ;;  %v2107_v28 = vpop.f32.mrb[9].mxu0 }
 0x2cc   : >> { %vm2122_vm14 = vcmp.gt.f32.partialorder %v2107_v28, %v2118_v25  ;;  %vm3546_vm0 = vmpackc.low %vm2121_vm13, %vm2121_vm13 }
 0x2cd   : >> { %vm3544_vm15 = vmpackc.low %vm2122_vm14, %vm2122_vm14 }
 0x2ce   : >> { %3545 = vmatprep.mubr.msk.bf16.mxu1 %vm3544_vm15, %v4721_v24  ;;  %vm3312_vm15 = vcmask (%p344_p1), 7168  }
 0x2cf   : >> { %3547 = vmatmul.mubr.msk.bf16.vlgmr.msra.gmra.mrb[8].mxu1 %vm3546_vm0, %v4721_v24 }
 0x2d0   : >> { %2760 = vmatpush1.msra.mxu1 %v2759_v34  ;;  %2823 = vmatprep.mubr.f32.mxu1 %v4720_v1 }
 0x2d1   : >> { %2840 = vmatprep.subr.mxu1 %v2839_v29 }
 0x2d7   : >> { %2829 = vmatmul.mubr.f32.vlgmr.msra.gmra.mrb[2].mxu1 %v4138_v51  ;;  %v3552_v51 = vld [vmem:[%s4372_s13 + $0x6] sm:$0x3] }
 0x2d8   : >> { %2846 = vmatpush1.msra.mxu1 %v2845_v46  ;;  %2909 = vmatprep.mubr.f32.mxu1 %v4720_v1  ;;  %v2674_v23 = vrot.slane %v3552_v51, %v4375_v16 }
 0x2d9   : >> { %2919 = vmatprep.subr.mxu1 %v2836_v33  ;;  %v2670_v33 = vrot.slane %v3552_v51, %v4368_v14 }
 0x2df   : >> { %2911 = vmatmul.mubr.f32.vlgmr.msra.gmra.mrb[2].mxu1 %v4112_v37 }
 0x2e0   : >> { %2922 = vmatpush1.msra.mxu1 %v2842_v12  ;;  %2985 = vmatprep.mubr.f32.mxu1 %v4720_v1 }
 0x2e1   : >> { %2995 = vmatprep.subr.mxu1 %v4471_v15 }
 0x2e7   : >> { %2988 = vmatmul.mubr.f32.vlgmr.msra.gmra.mrb[2].mxu1 %v4115_v38 }
 0x2e8   : >> { %2997 = vmatpush1.msra.mxu1 %v2759_v34  ;;  %3060 = vmatprep.mubr.f32.mxu1 %v4720_v1 }
 0x2e9   : >> { %3073 = vmatprep.subr.mxu1 %v2837_v13 }
 0x2ef   : >> { %3064 = vmatmul.mubr.f32.vlgmr.msra.gmra.mrb[2].mxu1 %v4124_v43 }
 0x2f0   : >> { %3077 = vmatpush1.msra.mxu1 %v2843_v26  ;;  %3140 = vmatprep.mubr.f32.mxu1 %v4720_v1 }
 0x2f1   : >> { %3149 = vmatprep.subr.mxu1 %v4471_v15 }
 0x2f6   : >> { %v2661_v20 = vpop.f32.mrb[10].mxu0 }
 0x2f7   : >> { %vm2677_vm1 = vcmp.gt.f32.partialorder %v2661_v20, %v2670_v33  ;;  %v2663_v11 = vpop.f32.mrb[11].mxu0  ;;  %3142 = vmatmul.mubr.f32.vlgmr.msra.gmra.mrb[2].mxu1 %v4112_v37 }
 0x2f8   : >> { %vm3559_vm2 = vmpackc.low %vm2677_vm1, %vm2677_vm1  ;;  %vm2678_vm3 = vcmp.gt.f32.partialorder %v2663_v11, %v2674_v23  ;;  %3151 = vmatpush1.msra.mxu1 %v2759_v34  ;;  %3214 = vmatprep.mubr.f32.mxu1 %v4720_v1  ;;  %v3541_v1 = vld [vmem:[%s4485_s14 + $0x4] sm:$0x3] }
 0x2f9   : >> { %vm3557_vm4 = vmpackc.low %vm2678_vm3, %vm2678_vm3  ;;  %3241 = vmatprep.subr.bf16.mxu1 %v4128_v44 }
 0x2fa   : >> { %3558 = vmatprep.mubr.msk.bf16.mxu0 %vm3557_vm4, %v4721_v24 }
 0x2fb   : >> { %3560 = vmatmul.mubr.msk.bf16.vlgmr.msra.gmra.mrb[12].mxu0 %vm3559_vm2, %v4721_v24 }
 0x2ff   : >> { %3216 = vmatmul.mubr.f32.vlgmr.msra.gmra.mrb[2].mxu1 %v4112_v37 }
 0x300   : >> { %3242 = vmatpush1.bf16.msra.mxu1 %v4136_v48  ;;  %v3554_v48 = vld [vmem:[%s4485_s14 + $0x6] sm:$0x3] }
 0x301   : >> { %3243 = vmatprep.subr.bf16.mxu1 %v4143_v52  ;;  %v2734_v52 = vrot.slane %v3554_v48, %v4368_v14 }
 0x304   : >> { %3244 = vmatpush1.bf16.msra.mxu1 %v4149_v55  ;;  %v3565_v55 = vld [vmem:[%s4372_s13 + $0x8] sm:$0x3] }
 0x305   : >> { %3245 = vmatprep.subr.bf16.mxu1 %v4154_v58  ;;  %v2738_v58 = vrot.slane %v3554_v48, %v4375_v16 }
 0x308   : >> { %3246 = vmatpush1.bf16.msra.mxu1 %v4159_v59 }
 0x309   : >> { %3247 = vmatprep.subr.bf16.mxu1 %v4164_v60 }
 0x30c   : >> { %3248 = vmatpush1.bf16.msra.mxu1 %v4171_v61  ;;  %v3226_v61 = vrot.slane %v3565_v55, %v4368_v14 }
 0x30d   : >> { %3249 = vmatprep.subr.bf16.mxu1 %v4176_v62 }
 0x310   : >> { %3250 = vmatpush1.bf16.msra.mxu1 %v4181_v63 }
 0x311   : >> { %3251 = vmatprep.subr.bf16.mxu1 %v4187_v0 }
 0x314   : >> { %3252 = vmatpush1.bf16.msra.mxu1 %v4195_v39 }
 0x315   : >> { %3253 = vmatprep.subr.bf16.mxu1 %v4200_v40 }
 0x318   : >> { %3254 = vmatpush1.bf16.msra.mxu1 %v4208_v47 }
 0x319   : >> { %3255 = vmatprep.subr.bf16.mxu1 %v4214_v49 }
 0x31c   : >> { %3256 = vmatpush1.bf16.msra.mxu1 %v4223_v56  ;;  %v3567_v56 = vld [vmem:[%s4485_s14 + $0x8] sm:$0x3] }
 0x31d   : >> { %3257 = vmatprep.subr.bf16.mxu1 %v4228_v57  ;;  %v3290_v57 = vrot.slane %v3567_v56, %v4368_v14 }
 0x320   : >> { %3258 = vmatpush1.bf16.msra.mxu1 %v4234_v41  ;;  %v3294_v41 = vrot.slane %v3567_v56, %v4375_v16 }
 0x321   : >> { %3259 = vmatprep.subr.bf16.mxu1 %v4240_v36 }
 0x324   : >> { %3260 = vmatpush1.bf16.msra.mxu1 %v4248_v3  ;;  %v2178_v3 = vrot.slane %v3541_v1, %v4368_v14 }
 0x325   : >> { %3261 = vmatprep.subr.bf16.mxu1 %v4253_v4  ;;  %v2182_v4 = vrot.slane %v3541_v1, %v4375_v16 }
 0x328   : >> { %3262 = vmatpush1.bf16.msra.mxu1 %v4258_v6 }
 0x329   : >> { %3263 = vmatprep.subr.bf16.mxu1 %v4264_v7 }
 0x32c   : >> { %3264 = vmatpush1.bf16.msra.mxu1 %v4271_v2 }
 0x32d   : >> { %3265 = vmatprep.subr.bf16.mxu1 %v4277_v9 }
 0x330   : >> { %3266 = vmatpush1.bf16.msra.mxu1 %v4283_v5 }
 0x331   : >> { %3267 = vmatprep.subr.bf16.mxu1 %v4288_v42 }
 0x334   : >> { %3268 = vmatpush1.bf16.msra.mxu1 %v4293_v8 }
 0x335   : >> { %3269 = vmatprep.subr.bf16.mxu1 %v4299_v54 }
 0x338   : >> { %3270 = vmatpush1.bf16.msra.mxu1 %v4336_v35 }
 0x339   : >> { %3271 = vmatprep.subr.bf16.mxu1 %v4343_v45 }
 0x33c   : >> { %3272 = vmatpush1.bf16.msra.mxu1 %v4347_v53 }
 0x3a2   : >> { %v2163_v6 = vpop.f32.mrb[8].mxu1 }
 0x3a3   : >> { %vm2172_vm5 = vcmp.gt.f32.partialorder %v2163_v6, %v4490_v21  ;;  %v2165_v7 = vpop.f32.mrb[9].mxu1 }
 0x3a4   : >> { %v2185_v9 = vsel %vm2172_vm5, %v2178_v3, 0.0  ;;  %vm2173_vm6 = vcmp.gt.f32.partialorder %v2165_v7, %v4494_v22  ;;  %v2167_v34 = vpop.f32.mrb[10].mxu1 }
 0x3a5   : >> { %v2187_v37 = vadd.f32 %v2185_v9, %v4505_v30  ;;  %v2186_v38 = vsel %vm2173_vm6, %v2182_v4, 0.0  ;;  %v2168_v43 = vpop.f32.mrb[11].mxu1  ;;  %v3230_v30 = vrot.slane %v3565_v55, %v4375_v16 }
 0x3a6   : >> { %v2188_v44 = vadd.f32 %v2186_v38, %v4507_v32 }
 0x3ce   : >> { %v2719_v59 = vpop.f32.mrb[12].mxu0 }
 0x3cf   : >> { %vm2728_vm7 = vcmp.gt.f32.partialorder %v2719_v59, %v4490_v21  ;;  %v2721_v60 = vpop.f32.mrb[13].mxu0 }
 0x3d0   : >> { %v2741_v62 = vsel %vm2728_vm7, %v2734_v52, 0.0  ;;  %vm2729_vm8 = vcmp.gt.f32.partialorder %v2721_v60, %v4494_v22  ;;  %v2723_v63 = vpop.f32.mrb[14].mxu0 }
 0x3d1   : >> { %v2743_v32 = vadd.f32 %v2741_v62, %v2187_v37  ;;  %v2742_v0 = vsel %vm2729_vm8, %v2738_v58, 0.0  ;;  %v2724_v39 = vpop.f32.mrb[15].mxu0 }
 0x3d2   : >> { %v2744_v40 = vadd.f32 %v2742_v0, %v2188_v44  ;;  %v3217_v47 = vpop.f32.mrb[2].mxu1 }
 0x3d3   : >> { %vm3233_vm9 = vcmp.gt.f32.partialorder %v3217_v47, %v3226_v61  ;;  %v3219_v49 = vpop.f32.mrb[3].mxu1 }
 0x3d4   : >> { %vm3234_vm10 = vcmp.gt.f32.partialorder %v3219_v49, %v3230_v30  ;;  %vm3572_vm12 = vmpackc.low %vm3233_vm9, %vm3233_vm9 }
 0x3d5   : >> { %vm3570_vm11 = vmpackc.low %vm3234_vm10, %vm3234_vm10 }
 0x3d6   : >> { %3571 = vmatprep.mubr.msk.bf16.mxu1 %vm3570_vm11, %v4721_v24 }
 0x3d7   : >> { %3573 = vmatmul.mubr.msk.bf16.vlgmr.msra.gmra.mrb[12].mxu1 %vm3572_vm12, %v4721_v24 }
 0x4aa   : >> { %v3275_v36 = vpop.f32.mrb[12].mxu1  ;;  %346 = sbr.rel (!%p344_p1) target bundleno = 138 (0x8a), region = 113 }
 0x4ab   : >> { %vm3284_vm13 = vcmp.gt.f32.partialorder %v3275_v36, %v4490_v21  ;;  %v3277_v2 = vpop.f32.mrb[13].mxu1 }
 0x4ac   : >> { %v3297_v5 = vsel %vm3284_vm13, %v3290_v57, 0.0  ;;  %vm3285_vm14 = vcmp.gt.f32.partialorder %v3277_v2, %v4494_v22  ;;  %v3279_v42 = vpop.f32.mrb[14].mxu1 }
 0x4ad   : >> { %v3299_v8 = vadd.f32 %v3297_v5, %v2743_v32  ;;  %v3298_v54 = vsel %vm3285_vm14, %v3294_v41, 0.0  ;;  %v3280_v35 = vpop.f32.mrb[15].mxu1 }
 0x4ae   : >> { %v3300_v45 = vadd.f32 %v3298_v54, %v2744_v40 }
 0x4af   : >> { %3301 = vst [vmem:[#allocation2] sm:$0xff] %v3299_v8 }
 0x4b0   : >> { %3302 = vst [vmem:[#allocation2 + $0x8] sm:$0xff] %v3300_v45 }
 0x4b6   : > { %v3303_v14 = vld [vmem:[#allocation2] sm:$0xff] }
 0x4b7   : > { %v3304_v16 = vld [vmem:[#allocation2 + $0x8] sm:$0xff] }
 0x4b8   : > { %v3305_v24 = vadd.f32 %v3304_v16, %v3303_v14 }
 0x4ba   : > { %3306 = vadd.xlane.f32.xlu0 %v3305_v24 }
 0x547   : > { %v3307_v53 = vpop.xlane.xlu0 %3306 }
 0x548   : > { %v3308_v15 = vmul.f32 -0.0009761077, %v3307_v53 }
 0x54a   : > { %3694 = vpow2.f32 %v3308_v15 }
 0x554   : > { %v3695_v21 = vpop.eup %3694 }
 0x555   : > { %v3310_v22 = vsub.f32 0.0, %v3695_v21 }
 0x557   : > { %v3574_v17 = vadd.f32 0.5, %v3310_v22 }
 0x559   : > { %3313 = vst.msk [vmem:[%s4030_s8] sm:$0xff] %vm3312_vm15, %v3574_v17 }
 0x55a PF: > { %s19_s21 = sadd.s32 1, %s3830_s21  }
 0x55b   : > { %p16_p4 = scmp.ge.s32.totalorder %s19_s21, 4  }
 0x55d   :  { %18 = sbr.rel (!%p16_p4) target bundleno = 3 (0x3), region = 124 }
 0x564   :  { %3333 = vsyncpa [#allocation4], 1 }
 0x565   :  { %3335 = vsyncpa [#allocation4 + $0x1], 1 }
 0x566   :  { %3336 = vsyncpa [#allocation6], 1 }
 0x567   :  { %3337 = vsyncpa [#allocation9], 1 }

</bundles_post_ra>
